<compile_context>
chip_gen: v7x
topology: tpu7x:2x2x1
jax: 0.10.0
libtpu: 0.0.40
codegen_flags: <defaults>
</compile_context>

<pallas_src>
import math

import jax
import jax.numpy as jnp
from jax.experimental import pallas as pl
from jax.experimental.pallas import tpu as pltpu

# ---- model hyper-parameters (LSTMModel(input_dim=4, hidden_dim=32,
#      num_layers=2, output_dim=1), batch=2, seq=8) --------------------------
B, S = 2, 8
INPUT_DIM, HIDDEN, NUM_LAYERS, OUTPUT_DIM = 4, 32, 2, 1
G4 = 4 * HIDDEN  # fused gate width (i|f|g|o) = 128 -> lane-dense

# ---- packed-weight-slab layout (all row offsets are multiples of 8 so every
#      in-kernel read is a sublane-aligned static slice) ---------------------
OFF_WIH1 = 0      # [INPUT_DIM, 128]   layer-1 input->gates  (i/f/o cols *0.5)
OFF_WHH1 = 8      # [128, 128]         layer-1 hidden->gates, rows H..127 zero
OFF_B1 = 136      # [1, 128]           layer-1 bias (b_ih + b_hh), folded
OFF_WIH2 = 144    # [128, 128]         layer-2 input->gates, rows H..127 zero
OFF_WHH2 = 272    # [128, 128]         layer-2 hidden->gates, rows H..127 zero
OFF_B2 = 400      # [1, 128]           layer-2 bias, folded
OFF_WFC = 408     # [1, 128]           fc weight as a row, lanes H..127 zero
OFF_BFC = 416     # [1, 128]           fc bias in lane 0
SLAB_ROWS = 424   # ~217 KB f32, trivially VMEM-resident on v5e/v6e/v7x

# XLU lane-roll shifts that bring the f / g / o gate chunks down to lanes 0:H
_SHIFT_F = G4 - 1 * HIDDEN   # 96
_SHIFT_G = G4 - 2 * HIDDEN   # 64
_SHIFT_O = G4 - 3 * HIDDEN   # 32


# --------------------------- fused Pallas kernel ----------------------------

def lstm_forward_kernel(x_ref, w_ref, o_ref):
    """Whole LSTMModel forward: 2-layer LSTM wavefront -> last step -> fc."""
    # ---- hoisted layer-1 input projection: one lane-dense matmul ----------
    w_ih1 = w_ref[OFF_WIH1:OFF_WIH1 + INPUT_DIM, :]          # [4, 128]
    b1 = w_ref[OFF_B1:OFF_B1 + 1, :]                         # [1, 128]
    xg1 = jnp.dot(x_ref[...], w_ih1,
                  preferred_element_type=jnp.float32) + b1   # [S*B, 128]

    b2 = w_ref[OFF_B2:OFF_B2 + 1, :]                         # [1, 128]

    # State kept 128 lanes wide; only lanes [0:HIDDEN) are meaningful.  The
    # junk lanes stay bounded and are annihilated by the zero weight rows.
    h1 = jnp.zeros((B, G4), jnp.float32)
    c1 = jnp.zeros((B, G4), jnp.float32)
    h2 = jnp.zeros((B, G4), jnp.float32)
    c2 = jnp.zeros((B, G4), jnp.float32)

    def cell(gates, c):
        # i/f/o columns were pre-scaled by 0.5, so one tanh over the full
        # [B,128] vreg gives sigmoid via 0.5*(tanh(x/2)+1); g keeps its tanh.
        th = jnp.tanh(gates)                                  # 1 EUP op/step
        sg = 0.5 * th + 0.5            # [sig_i | sig_f |  --  | sig_o]
        f0 = pltpu.roll(sg, shift=_SHIFT_F, axis=1)   # sig_f  -> lanes 0:H
        g0 = pltpu.roll(th, shift=_SHIFT_G, axis=1)   # tanh_g -> lanes 0:H
        o0 = pltpu.roll(sg, shift=_SHIFT_O, axis=1)   # sig_o  -> lanes 0:H
        c_new = f0 * c + sg * g0       # lanes 0:H = f*c + i*g
        h_new = o0 * jnp.tanh(c_new)   # lanes 0:H = o*tanh(c)
        return h_new, c_new

    # ---- two-layer wavefront recurrence (static unroll, S = 8) ------------
    for t in range(S):
        g1 = xg1[t * B:(t + 1) * B, :] + jnp.dot(
            h1, w_ref[OFF_WHH1:OFF_WHH1 + G4, :],
            preferred_element_type=jnp.float32)
        h1, c1 = cell(g1, c1)
        # layer-2 step t launches as soon as h1_t exists, so its latency hides
        # under layer-1's serial chain.  Inter-layer dropout: identity (eval).
        g2 = (jnp.dot(h1, w_ref[OFF_WIH2:OFF_WIH2 + G4, :],
                      preferred_element_type=jnp.float32)
              + jnp.dot(h2, w_ref[OFF_WHH2:OFF_WHH2 + G4, :],
                        preferred_element_type=jnp.float32)
              + b2)
        h2, c2 = cell(g2, c2)

    # ---- last timestep -> Dropout (identity, eval) -> fc head -------------
    # w_fc stored as a 128-lane row (zero beyond HIDDEN); OUTPUT_DIM == 1 so
    # the matvec is a single cross-lane reduce on the otherwise-idle XLU.
    w_fc_row = w_ref[OFF_WFC:OFF_WFC + 1, :]                  # [1, 128]
    b_fc = w_ref[OFF_BFC:OFF_BFC + 1, 0:OUTPUT_DIM]           # [1, 1]
    out = jnp.sum(h2 * w_fc_row, axis=-1, keepdims=True)      # [B, 1]
    o_ref[...] = out + b_fc


# --------------------------- wrapper -----------------------------------------

def lstm_model_forward(x, weight_slab):
    # time-major 2-D activation layout: row t*B + b holds x[b, t, :]
    # (wrapper-side layout plumbing only).
    x2d = jnp.transpose(x, (1, 0, 2)).reshape(S * B, INPUT_DIM)
    return pl.pallas_call(
        lstm_forward_kernel,
        out_shape=jax.ShapeDtypeStruct((B, OUTPUT_DIM), jnp.float32),
        in_specs=[pl.BlockSpec(memory_space=pltpu.MemorySpace.VMEM),
                  pl.BlockSpec(memory_space=pltpu.MemorySpace.VMEM)],
        out_specs=pl.BlockSpec(memory_space=pltpu.MemorySpace.VMEM),
    )(x2d, weight_slab)


# --------------------------- parameters / packing ----------------------------

def init_params(key):
    """Plain (unfolded) weights, PyTorch layout pre-transposed to [in, 4H]."""
    stdv = 1.0 / math.sqrt(HIDDEN)  # PyTorch LSTM / Linear default init range

    def unif(k, shape):
        return jax.random.uniform(k, shape, jnp.float32, -stdv, stdv)

    keys = jax.random.split(key, NUM_LAYERS + 2)
    layers = []
    for l in range(NUM_LAYERS):
        lk = jax.random.split(keys[l], 4)
        din = INPUT_DIM if l == 0 else HIDDEN
        w_ih = unif(lk[0], (din, G4))      # [in, 4H], gate order i|f|g|o
        w_hh = unif(lk[1], (HIDDEN, G4))   # [H, 4H]
        b_ih = unif(lk[2], (1, G4))
        b_hh = unif(lk[3], (1, G4))
        layers.append({"w_ih": w_ih, "w_hh": w_hh, "b": b_ih + b_hh})

    fk = jax.random.split(keys[NUM_LAYERS], 2)
    return {
        "layers": layers,
        "w_fc": unif(fk[0], (HIDDEN, OUTPUT_DIM)),
        "b_fc": unif(fk[1], (1, OUTPUT_DIM)),
    }


def _fold_gates(w):
    """Scale i/f/o gate columns by 0.5: sigmoid(x) == 0.5*(tanh(x/2)+1)."""
    scale = jnp.concatenate([
        jnp.full((HIDDEN,), 0.5, jnp.float32),
        jnp.full((HIDDEN,), 0.5, jnp.float32),
        jnp.ones((HIDDEN,), jnp.float32),
        jnp.full((HIDDEN,), 0.5, jnp.float32)])
    return (w * scale).astype(jnp.float32)


def pack_weight_slab(params):
    """Pack all weights into one 128-lane slab (done once, off the hot path).
    When loading real PyTorch checkpoints: transpose weight_ih/hh to [in,4H]
    and sum b_ih + b_hh before calling this."""
    l1, l2 = params["layers"]
    slab = jnp.zeros((SLAB_ROWS, G4), jnp.float32)
    slab = slab.at[OFF_WIH1:OFF_WIH1 + INPUT_DIM, :].set(_fold_gates(l1["w_ih"]))
    slab = slab.at[OFF_WHH1:OFF_WHH1 + HIDDEN, :].set(_fold_gates(l1["w_hh"]))
    slab = slab.at[OFF_B1:OFF_B1 + 1, :].set(_fold_gates(l1["b"]))
    slab = slab.at[OFF_WIH2:OFF_WIH2 + HIDDEN, :].set(_fold_gates(l2["w_ih"]))
    slab = slab.at[OFF_WHH2:OFF_WHH2 + HIDDEN, :].set(_fold_gates(l2["w_hh"]))
    slab = slab.at[OFF_B2:OFF_B2 + 1, :].set(_fold_gates(l2["b"]))
    slab = slab.at[OFF_WFC:OFF_WFC + 1, :HIDDEN].set(jnp.transpose(params["w_fc"]))
    slab = slab.at[OFF_BFC:OFF_BFC + 1, :OUTPUT_DIM].set(params["b_fc"])
    return slab


# --------------------------- pure-JAX reference ------------------------------

def lstm_forward_ref(x, params):
    """Standard sigmoid/tanh LSTM math (unfolded weights) for correctness."""
    layer_in = x
    h = jnp.zeros((B, HIDDEN), jnp.float32)
    for lp in params["layers"]:
        h = jnp.zeros((B, HIDDEN), jnp.float32)
        c = jnp.zeros((B, HIDDEN), jnp.float32)
        outs = []
        for t in range(S):
            gates = layer_in[:, t, :] @ lp["w_ih"] + h @ lp["w_hh"] + lp["b"]
            i = jax.nn.sigmoid(gates[:, 0 * HIDDEN:1 * HIDDEN])
            f = jax.nn.sigmoid(gates[:, 1 * HIDDEN:2 * HIDDEN])
            g = jnp.tanh(gates[:, 2 * HIDDEN:3 * HIDDEN])
            o = jax.nn.sigmoid(gates[:, 3 * HIDDEN:4 * HIDDEN])
            c = f * c + i * g
            h = o * jnp.tanh(c)
            outs.append(h)
        layer_in = jnp.stack(outs, axis=1)
    return h @ params["w_fc"] + params["b_fc"]


# --------------------------- main ---------------------------------------------

if __name__ == "__main__":
    key = jax.random.PRNGKey(0)
    k_param, k_data = jax.random.split(key)
    params = init_params(k_param)
    weight_slab = pack_weight_slab(params)
    x = jax.random.normal(k_data, (B, S, INPUT_DIM), jnp.float32)

    out = lstm_model_forward(x, weight_slab)
    jax.block_until_ready(out)
    assert out.shape == (B, OUTPUT_DIM)

    ref = lstm_forward_ref(x, params)
    assert jnp.allclose(out, ref, atol=1e-3, rtol=1e-3), (out, ref)

    print("KERNEL_OK")
</pallas_src>

<mosaic_0001>
module attributes {stable_mosaic.version = 11 : i64} {
  func.func @lstm_forward_kernel(%arg0: memref<16x4xf32, #tpu.memory_space<vmem>>, %arg1: memref<424x128xf32, #tpu.memory_space<vmem>>, %arg2: memref<2x1xf32, #tpu.memory_space<vmem>>) attributes {dimension_semantics = [], scalar_prefetch = 0 : i64, scratch_operands = 0 : i64, tpu.core_type = #tpu.core_type<tc>} {
    %c0 = arith.constant 0 : index
    %c0_0 = arith.constant 0 : index
    %0 = vector.load %arg1[%c0, %c0_0] : memref<424x128xf32, #tpu.memory_space<vmem>>, vector<4x128xf32>
    %c136 = arith.constant 136 : index
    %c0_1 = arith.constant 0 : index
    %1 = vector.load %arg1[%c136, %c0_1] : memref<424x128xf32, #tpu.memory_space<vmem>>, vector<1x128xf32>
    %c0_2 = arith.constant 0 : index
    %c0_3 = arith.constant 0 : index
    %2 = vector.load %arg0[%c0_2, %c0_3] : memref<16x4xf32, #tpu.memory_space<vmem>>, vector<16x4xf32>
    %cst = arith.constant dense<0.000000e+00> : vector<16x128xf32>
    %3 = tpu.matmul %2, %0, %cst {dimension_numbers = #tpu.dot_dimension_numbers<[1], [0], [0], [1], [0, 0, 1, 1], [], []>} : vector<16x4xf32>, vector<4x128xf32>, vector<16x128xf32> -> vector<16x128xf32>
    %4 = vector.broadcast %1 : vector<1x128xf32> to vector<16x128xf32>
    %5 = arith.addf %3, %4 : vector<16x128xf32>
    %c400 = arith.constant 400 : index
    %c0_4 = arith.constant 0 : index
    %6 = vector.load %arg1[%c400, %c0_4] : memref<424x128xf32, #tpu.memory_space<vmem>>, vector<1x128xf32>
    %cst_5 = arith.constant 0.000000e+00 : f32
    %7 = vector.broadcast %cst_5 : f32 to vector<2x128xf32>
    %cst_6 = arith.constant 0.000000e+00 : f32
    %8 = vector.broadcast %cst_6 : f32 to vector<2x128xf32>
    %cst_7 = arith.constant 0.000000e+00 : f32
    %9 = vector.broadcast %cst_7 : f32 to vector<2x128xf32>
    %cst_8 = arith.constant 0.000000e+00 : f32
    %10 = vector.broadcast %cst_8 : f32 to vector<2x128xf32>
    %11 = vector.extract_strided_slice %5 {offsets = [0, 0], sizes = [2, 128], strides = [1, 1]} : vector<16x128xf32> to vector<2x128xf32>
    %c8 = arith.constant 8 : index
    %c0_9 = arith.constant 0 : index
    %12 = vector.load %arg1[%c8, %c0_9] : memref<424x128xf32, #tpu.memory_space<vmem>>, vector<128x128xf32>
    %cst_10 = arith.constant dense<0.000000e+00> : vector<2x128xf32>
    %13 = tpu.matmul %7, %12, %cst_10 {dimension_numbers = #tpu.dot_dimension_numbers<[1], [0], [0], [1], [0, 0, 1, 1], [], []>} : vector<2x128xf32>, vector<128x128xf32>, vector<2x128xf32> -> vector<2x128xf32>
    %14 = arith.addf %11, %13 : vector<2x128xf32>
    %15 = math.tanh %14 : vector<2x128xf32>
    %cst_11 = arith.constant 5.000000e-01 : f32
    %16 = vector.broadcast %cst_11 : f32 to vector<2x128xf32>
    %17 = arith.mulf %16, %15 : vector<2x128xf32>
    %cst_12 = arith.constant 5.000000e-01 : f32
    %18 = vector.broadcast %cst_12 : f32 to vector<2x128xf32>
    %19 = arith.addf %17, %18 : vector<2x128xf32>
    %c96_i32 = arith.constant 96 : i32
    %20 = tpu.dynamic_rotate %19 by %c96_i32 dim 1 : vector<2x128xf32>, i32 -> vector<2x128xf32>
    %c64_i32 = arith.constant 64 : i32
    %21 = tpu.dynamic_rotate %15 by %c64_i32 dim 1 : vector<2x128xf32>, i32 -> vector<2x128xf32>
    %c32_i32 = arith.constant 32 : i32
    %22 = tpu.dynamic_rotate %19 by %c32_i32 dim 1 : vector<2x128xf32>, i32 -> vector<2x128xf32>
    %23 = arith.mulf %20, %8 : vector<2x128xf32>
    %24 = arith.mulf %19, %21 : vector<2x128xf32>
    %25 = arith.addf %23, %24 : vector<2x128xf32>
    %26 = math.tanh %25 : vector<2x128xf32>
    %27 = arith.mulf %22, %26 : vector<2x128xf32>
    %c144 = arith.constant 144 : index
    %c0_13 = arith.constant 0 : index
    %28 = vector.load %arg1[%c144, %c0_13] : memref<424x128xf32, #tpu.memory_space<vmem>>, vector<128x128xf32>
    %cst_14 = arith.constant dense<0.000000e+00> : vector<2x128xf32>
    %29 = tpu.matmul %27, %28, %cst_14 {dimension_numbers = #tpu.dot_dimension_numbers<[1], [0], [0], [1], [0, 0, 1, 1], [], []>} : vector<2x128xf32>, vector<128x128xf32>, vector<2x128xf32> -> vector<2x128xf32>
    %c272 = arith.constant 272 : index
    %c0_15 = arith.constant 0 : index
    %30 = vector.load %arg1[%c272, %c0_15] : memref<424x128xf32, #tpu.memory_space<vmem>>, vector<128x128xf32>
    %cst_16 = arith.constant dense<0.000000e+00> : vector<2x128xf32>
    %31 = tpu.matmul %9, %30, %cst_16 {dimension_numbers = #tpu.dot_dimension_numbers<[1], [0], [0], [1], [0, 0, 1, 1], [], []>} : vector<2x128xf32>, vector<128x128xf32>, vector<2x128xf32> -> vector<2x128xf32>
    %32 = arith.addf %29, %31 : vector<2x128xf32>
    %33 = vector.broadcast %6 : vector<1x128xf32> to vector<2x128xf32>
    %34 = arith.addf %32, %33 : vector<2x128xf32>
    %35 = math.tanh %34 : vector<2x128xf32>
    %cst_17 = arith.constant 5.000000e-01 : f32
    %36 = vector.broadcast %cst_17 : f32 to vector<2x128xf32>
    %37 = arith.mulf %36, %35 : vector<2x128xf32>
    %cst_18 = arith.constant 5.000000e-01 : f32
    %38 = vector.broadcast %cst_18 : f32 to vector<2x128xf32>
    %39 = arith.addf %37, %38 : vector<2x128xf32>
    %c96_i32_19 = arith.constant 96 : i32
    %40 = tpu.dynamic_rotate %39 by %c96_i32_19 dim 1 : vector<2x128xf32>, i32 -> vector<2x128xf32>
    %c64_i32_20 = arith.constant 64 : i32
    %41 = tpu.dynamic_rotate %35 by %c64_i32_20 dim 1 : vector<2x128xf32>, i32 -> vector<2x128xf32>
    %c32_i32_21 = arith.constant 32 : i32
    %42 = tpu.dynamic_rotate %39 by %c32_i32_21 dim 1 : vector<2x128xf32>, i32 -> vector<2x128xf32>
    %43 = arith.mulf %40, %10 : vector<2x128xf32>
    %44 = arith.mulf %39, %41 : vector<2x128xf32>
    %45 = arith.addf %43, %44 : vector<2x128xf32>
    %46 = math.tanh %45 : vector<2x128xf32>
    %47 = arith.mulf %42, %46 : vector<2x128xf32>
    %48 = vector.extract_strided_slice %5 {offsets = [2, 0], sizes = [2, 128], strides = [1, 1]} : vector<16x128xf32> to vector<2x128xf32>
    %c8_22 = arith.constant 8 : index
    %c0_23 = arith.constant 0 : index
    %49 = vector.load %arg1[%c8_22, %c0_23] : memref<424x128xf32, #tpu.memory_space<vmem>>, vector<128x128xf32>
    %cst_24 = arith.constant dense<0.000000e+00> : vector<2x128xf32>
    %50 = tpu.matmul %27, %49, %cst_24 {dimension_numbers = #tpu.dot_dimension_numbers<[1], [0], [0], [1], [0, 0, 1, 1], [], []>} : vector<2x128xf32>, vector<128x128xf32>, vector<2x128xf32> -> vector<2x128xf32>
    %51 = arith.addf %48, %50 : vector<2x128xf32>
    %52 = math.tanh %51 : vector<2x128xf32>
    %cst_25 = arith.constant 5.000000e-01 : f32
    %53 = vector.broadcast %cst_25 : f32 to vector<2x128xf32>
    %54 = arith.mulf %53, %52 : vector<2x128xf32>
    %cst_26 = arith.constant 5.000000e-01 : f32
    %55 = vector.broadcast %cst_26 : f32 to vector<2x128xf32>
    %56 = arith.addf %54, %55 : vector<2x128xf32>
    %c96_i32_27 = arith.constant 96 : i32
    %57 = tpu.dynamic_rotate %56 by %c96_i32_27 dim 1 : vector<2x128xf32>, i32 -> vector<2x128xf32>
    %c64_i32_28 = arith.constant 64 : i32
    %58 = tpu.dynamic_rotate %52 by %c64_i32_28 dim 1 : vector<2x128xf32>, i32 -> vector<2x128xf32>
    %c32_i32_29 = arith.constant 32 : i32
    %59 = tpu.dynamic_rotate %56 by %c32_i32_29 dim 1 : vector<2x128xf32>, i32 -> vector<2x128xf32>
    %60 = arith.mulf %57, %25 : vector<2x128xf32>
    %61 = arith.mulf %56, %58 : vector<2x128xf32>
    %62 = arith.addf %60, %61 : vector<2x128xf32>
    %63 = math.tanh %62 : vector<2x128xf32>
    %64 = arith.mulf %59, %63 : vector<2x128xf32>
    %c144_30 = arith.constant 144 : index
    %c0_31 = arith.constant 0 : index
    %65 = vector.load %arg1[%c144_30, %c0_31] : memref<424x128xf32, #tpu.memory_space<vmem>>, vector<128x128xf32>
    %cst_32 = arith.constant dense<0.000000e+00> : vector<2x128xf32>
    %66 = tpu.matmul %64, %65, %cst_32 {dimension_numbers = #tpu.dot_dimension_numbers<[1], [0], [0], [1], [0, 0, 1, 1], [], []>} : vector<2x128xf32>, vector<128x128xf32>, vector<2x128xf32> -> vector<2x128xf32>
    %c272_33 = arith.constant 272 : index
    %c0_34 = arith.constant 0 : index
    %67 = vector.load %arg1[%c272_33, %c0_34] : memref<424x128xf32, #tpu.memory_space<vmem>>, vector<128x128xf32>
    %cst_35 = arith.constant dense<0.000000e+00> : vector<2x128xf32>
    %68 = tpu.matmul %47, %67, %cst_35 {dimension_numbers = #tpu.dot_dimension_numbers<[1], [0], [0], [1], [0, 0, 1, 1], [], []>} : vector<2x128xf32>, vector<128x128xf32>, vector<2x128xf32> -> vector<2x128xf32>
    %69 = arith.addf %66, %68 : vector<2x128xf32>
    %70 = vector.broadcast %6 : vector<1x128xf32> to vector<2x128xf32>
    %71 = arith.addf %69, %70 : vector<2x128xf32>
    %72 = math.tanh %71 : vector<2x128xf32>
    %cst_36 = arith.constant 5.000000e-01 : f32
    %73 = vector.broadcast %cst_36 : f32 to vector<2x128xf32>
    %74 = arith.mulf %73, %72 : vector<2x128xf32>
    %cst_37 = arith.constant 5.000000e-01 : f32
    %75 = vector.broadcast %cst_37 : f32 to vector<2x128xf32>
    %76 = arith.addf %74, %75 : vector<2x128xf32>
    %c96_i32_38 = arith.constant 96 : i32
    %77 = tpu.dynamic_rotate %76 by %c96_i32_38 dim 1 : vector<2x128xf32>, i32 -> vector<2x128xf32>
    %c64_i32_39 = arith.constant 64 : i32
    %78 = tpu.dynamic_rotate %72 by %c64_i32_39 dim 1 : vector<2x128xf32>, i32 -> vector<2x128xf32>
    %c32_i32_40 = arith.constant 32 : i32
    %79 = tpu.dynamic_rotate %76 by %c32_i32_40 dim 1 : vector<2x128xf32>, i32 -> vector<2x128xf32>
    %80 = arith.mulf %77, %45 : vector<2x128xf32>
    %81 = arith.mulf %76, %78 : vector<2x128xf32>
    %82 = arith.addf %80, %81 : vector<2x128xf32>
    %83 = math.tanh %82 : vector<2x128xf32>
    %84 = arith.mulf %79, %83 : vector<2x128xf32>
    %85 = vector.extract_strided_slice %5 {offsets = [4, 0], sizes = [2, 128], strides = [1, 1]} : vector<16x128xf32> to vector<2x128xf32>
    %c8_41 = arith.constant 8 : index
    %c0_42 = arith.constant 0 : index
    %86 = vector.load %arg1[%c8_41, %c0_42] : memref<424x128xf32, #tpu.memory_space<vmem>>, vector<128x128xf32>
    %cst_43 = arith.constant dense<0.000000e+00> : vector<2x128xf32>
    %87 = tpu.matmul %64, %86, %cst_43 {dimension_numbers = #tpu.dot_dimension_numbers<[1], [0], [0], [1], [0, 0, 1, 1], [], []>} : vector<2x128xf32>, vector<128x128xf32>, vector<2x128xf32> -> vector<2x128xf32>
    %88 = arith.addf %85, %87 : vector<2x128xf32>
    %89 = math.tanh %88 : vector<2x128xf32>
    %cst_44 = arith.constant 5.000000e-01 : f32
    %90 = vector.broadcast %cst_44 : f32 to vector<2x128xf32>
    %91 = arith.mulf %90, %89 : vector<2x128xf32>
    %cst_45 = arith.constant 5.000000e-01 : f32
    %92 = vector.broadcast %cst_45 : f32 to vector<2x128xf32>
    %93 = arith.addf %91, %92 : vector<2x128xf32>
    %c96_i32_46 = arith.constant 96 : i32
    %94 = tpu.dynamic_rotate %93 by %c96_i32_46 dim 1 : vector<2x128xf32>, i32 -> vector<2x128xf32>
    %c64_i32_47 = arith.constant 64 : i32
    %95 = tpu.dynamic_rotate %89 by %c64_i32_47 dim 1 : vector<2x128xf32>, i32 -> vector<2x128xf32>
    %c32_i32_48 = arith.constant 32 : i32
    %96 = tpu.dynamic_rotate %93 by %c32_i32_48 dim 1 : vector<2x128xf32>, i32 -> vector<2x128xf32>
    %97 = arith.mulf %94, %62 : vector<2x128xf32>
    %98 = arith.mulf %93, %95 : vector<2x128xf32>
    %99 = arith.addf %97, %98 : vector<2x128xf32>
    %100 = math.tanh %99 : vector<2x128xf32>
    %101 = arith.mulf %96, %100 : vector<2x128xf32>
    %c144_49 = arith.constant 144 : index
    %c0_50 = arith.constant 0 : index
    %102 = vector.load %arg1[%c144_49, %c0_50] : memref<424x128xf32, #tpu.memory_space<vmem>>, vector<128x128xf32>
    %cst_51 = arith.constant dense<0.000000e+00> : vector<2x128xf32>
    %103 = tpu.matmul %101, %102, %cst_51 {dimension_numbers = #tpu.dot_dimension_numbers<[1], [0], [0], [1], [0, 0, 1, 1], [], []>} : vector<2x128xf32>, vector<128x128xf32>, vector<2x128xf32> -> vector<2x128xf32>
    %c272_52 = arith.constant 272 : index
    %c0_53 = arith.constant 0 : index
    %104 = vector.load %arg1[%c272_52, %c0_53] : memref<424x128xf32, #tpu.memory_space<vmem>>, vector<128x128xf32>
    %cst_54 = arith.constant dense<0.000000e+00> : vector<2x128xf32>
    %105 = tpu.matmul %84, %104, %cst_54 {dimension_numbers = #tpu.dot_dimension_numbers<[1], [0], [0], [1], [0, 0, 1, 1], [], []>} : vector<2x128xf32>, vector<128x128xf32>, vector<2x128xf32> -> vector<2x128xf32>
    %106 = arith.addf %103, %105 : vector<2x128xf32>
    %107 = vector.broadcast %6 : vector<1x128xf32> to vector<2x128xf32>
    %108 = arith.addf %106, %107 : vector<2x128xf32>
    %109 = math.tanh %108 : vector<2x128xf32>
    %cst_55 = arith.constant 5.000000e-01 : f32
    %110 = vector.broadcast %cst_55 : f32 to vector<2x128xf32>
    %111 = arith.mulf %110, %109 : vector<2x128xf32>
    %cst_56 = arith.constant 5.000000e-01 : f32
    %112 = vector.broadcast %cst_56 : f32 to vector<2x128xf32>
    %113 = arith.addf %111, %112 : vector<2x128xf32>
    %c96_i32_57 = arith.constant 96 : i32
    %114 = tpu.dynamic_rotate %113 by %c96_i32_57 dim 1 : vector<2x128xf32>, i32 -> vector<2x128xf32>
    %c64_i32_58 = arith.constant 64 : i32
    %115 = tpu.dynamic_rotate %109 by %c64_i32_58 dim 1 : vector<2x128xf32>, i32 -> vector<2x128xf32>
    %c32_i32_59 = arith.constant 32 : i32
    %116 = tpu.dynamic_rotate %113 by %c32_i32_59 dim 1 : vector<2x128xf32>, i32 -> vector<2x128xf32>
    %117 = arith.mulf %114, %82 : vector<2x128xf32>
    %118 = arith.mulf %113, %115 : vector<2x128xf32>
    %119 = arith.addf %117, %118 : vector<2x128xf32>
    %120 = math.tanh %119 : vector<2x128xf32>
    %121 = arith.mulf %116, %120 : vector<2x128xf32>
    %122 = vector.extract_strided_slice %5 {offsets = [6, 0], sizes = [2, 128], strides = [1, 1]} : vector<16x128xf32> to vector<2x128xf32>
    %c8_60 = arith.constant 8 : index
    %c0_61 = arith.constant 0 : index
    %123 = vector.load %arg1[%c8_60, %c0_61] : memref<424x128xf32, #tpu.memory_space<vmem>>, vector<128x128xf32>
    %cst_62 = arith.constant dense<0.000000e+00> : vector<2x128xf32>
    %124 = tpu.matmul %101, %123, %cst_62 {dimension_numbers = #tpu.dot_dimension_numbers<[1], [0], [0], [1], [0, 0, 1, 1], [], []>} : vector<2x128xf32>, vector<128x128xf32>, vector<2x128xf32> -> vector<2x128xf32>
    %125 = arith.addf %122, %124 : vector<2x128xf32>
    %126 = math.tanh %125 : vector<2x128xf32>
    %cst_63 = arith.constant 5.000000e-01 : f32
    %127 = vector.broadcast %cst_63 : f32 to vector<2x128xf32>
    %128 = arith.mulf %127, %126 : vector<2x128xf32>
    %cst_64 = arith.constant 5.000000e-01 : f32
    %129 = vector.broadcast %cst_64 : f32 to vector<2x128xf32>
    %130 = arith.addf %128, %129 : vector<2x128xf32>
    %c96_i32_65 = arith.constant 96 : i32
    %131 = tpu.dynamic_rotate %130 by %c96_i32_65 dim 1 : vector<2x128xf32>, i32 -> vector<2x128xf32>
    %c64_i32_66 = arith.constant 64 : i32
    %132 = tpu.dynamic_rotate %126 by %c64_i32_66 dim 1 : vector<2x128xf32>, i32 -> vector<2x128xf32>
    %c32_i32_67 = arith.constant 32 : i32
    %133 = tpu.dynamic_rotate %130 by %c32_i32_67 dim 1 : vector<2x128xf32>, i32 -> vector<2x128xf32>
    %134 = arith.mulf %131, %99 : vector<2x128xf32>
    %135 = arith.mulf %130, %132 : vector<2x128xf32>
    %136 = arith.addf %134, %135 : vector<2x128xf32>
    %137 = math.tanh %136 : vector<2x128xf32>
    %138 = arith.mulf %133, %137 : vector<2x128xf32>
    %c144_68 = arith.constant 144 : index
    %c0_69 = arith.constant 0 : index
    %139 = vector.load %arg1[%c144_68, %c0_69] : memref<424x128xf32, #tpu.memory_space<vmem>>, vector<128x128xf32>
    %cst_70 = arith.constant dense<0.000000e+00> : vector<2x128xf32>
    %140 = tpu.matmul %138, %139, %cst_70 {dimension_numbers = #tpu.dot_dimension_numbers<[1], [0], [0], [1], [0, 0, 1, 1], [], []>} : vector<2x128xf32>, vector<128x128xf32>, vector<2x128xf32> -> vector<2x128xf32>
    %c272_71 = arith.constant 272 : index
    %c0_72 = arith.constant 0 : index
    %141 = vector.load %arg1[%c272_71, %c0_72] : memref<424x128xf32, #tpu.memory_space<vmem>>, vector<128x128xf32>
    %cst_73 = arith.constant dense<0.000000e+00> : vector<2x128xf32>
    %142 = tpu.matmul %121, %141, %cst_73 {dimension_numbers = #tpu.dot_dimension_numbers<[1], [0], [0], [1], [0, 0, 1, 1], [], []>} : vector<2x128xf32>, vector<128x128xf32>, vector<2x128xf32> -> vector<2x128xf32>
    %143 = arith.addf %140, %142 : vector<2x128xf32>
    %144 = vector.broadcast %6 : vector<1x128xf32> to vector<2x128xf32>
    %145 = arith.addf %143, %144 : vector<2x128xf32>
    %146 = math.tanh %145 : vector<2x128xf32>
    %cst_74 = arith.constant 5.000000e-01 : f32
    %147 = vector.broadcast %cst_74 : f32 to vector<2x128xf32>
    %148 = arith.mulf %147, %146 : vector<2x128xf32>
    %cst_75 = arith.constant 5.000000e-01 : f32
    %149 = vector.broadcast %cst_75 : f32 to vector<2x128xf32>
    %150 = arith.addf %148, %149 : vector<2x128xf32>
    %c96_i32_76 = arith.constant 96 : i32
    %151 = tpu.dynamic_rotate %150 by %c96_i32_76 dim 1 : vector<2x128xf32>, i32 -> vector<2x128xf32>
    %c64_i32_77 = arith.constant 64 : i32
    %152 = tpu.dynamic_rotate %146 by %c64_i32_77 dim 1 : vector<2x128xf32>, i32 -> vector<2x128xf32>
    %c32_i32_78 = arith.constant 32 : i32
    %153 = tpu.dynamic_rotate %150 by %c32_i32_78 dim 1 : vector<2x128xf32>, i32 -> vector<2x128xf32>
    %154 = arith.mulf %151, %119 : vector<2x128xf32>
    %155 = arith.mulf %150, %152 : vector<2x128xf32>
    %156 = arith.addf %154, %155 : vector<2x128xf32>
    %157 = math.tanh %156 : vector<2x128xf32>
    %158 = arith.mulf %153, %157 : vector<2x128xf32>
    %159 = vector.extract_strided_slice %5 {offsets = [8, 0], sizes = [2, 128], strides = [1, 1]} : vector<16x128xf32> to vector<2x128xf32>
    %c8_79 = arith.constant 8 : index
    %c0_80 = arith.constant 0 : index
    %160 = vector.load %arg1[%c8_79, %c0_80] : memref<424x128xf32, #tpu.memory_space<vmem>>, vector<128x128xf32>
    %cst_81 = arith.constant dense<0.000000e+00> : vector<2x128xf32>
    %161 = tpu.matmul %138, %160, %cst_81 {dimension_numbers = #tpu.dot_dimension_numbers<[1], [0], [0], [1], [0, 0, 1, 1], [], []>} : vector<2x128xf32>, vector<128x128xf32>, vector<2x128xf32> -> vector<2x128xf32>
    %162 = arith.addf %159, %161 : vector<2x128xf32>
    %163 = math.tanh %162 : vector<2x128xf32>
    %cst_82 = arith.constant 5.000000e-01 : f32
    %164 = vector.broadcast %cst_82 : f32 to vector<2x128xf32>
    %165 = arith.mulf %164, %163 : vector<2x128xf32>
    %cst_83 = arith.constant 5.000000e-01 : f32
    %166 = vector.broadcast %cst_83 : f32 to vector<2x128xf32>
    %167 = arith.addf %165, %166 : vector<2x128xf32>
    %c96_i32_84 = arith.constant 96 : i32
    %168 = tpu.dynamic_rotate %167 by %c96_i32_84 dim 1 : vector<2x128xf32>, i32 -> vector<2x128xf32>
    %c64_i32_85 = arith.constant 64 : i32
    %169 = tpu.dynamic_rotate %163 by %c64_i32_85 dim 1 : vector<2x128xf32>, i32 -> vector<2x128xf32>
    %c32_i32_86 = arith.constant 32 : i32
    %170 = tpu.dynamic_rotate %167 by %c32_i32_86 dim 1 : vector<2x128xf32>, i32 -> vector<2x128xf32>
    %171 = arith.mulf %168, %136 : vector<2x128xf32>
    %172 = arith.mulf %167, %169 : vector<2x128xf32>
    %173 = arith.addf %171, %172 : vector<2x128xf32>
    %174 = math.tanh %173 : vector<2x128xf32>
    %175 = arith.mulf %170, %174 : vector<2x128xf32>
    %c144_87 = arith.constant 144 : index
    %c0_88 = arith.constant 0 : index
    %176 = vector.load %arg1[%c144_87, %c0_88] : memref<424x128xf32, #tpu.memory_space<vmem>>, vector<128x128xf32>
    %cst_89 = arith.constant dense<0.000000e+00> : vector<2x128xf32>
    %177 = tpu.matmul %175, %176, %cst_89 {dimension_numbers = #tpu.dot_dimension_numbers<[1], [0], [0], [1], [0, 0, 1, 1], [], []>} : vector<2x128xf32>, vector<128x128xf32>, vector<2x128xf32> -> vector<2x128xf32>
    %c272_90 = arith.constant 272 : index
    %c0_91 = arith.constant 0 : index
    %178 = vector.load %arg1[%c272_90, %c0_91] : memref<424x128xf32, #tpu.memory_space<vmem>>, vector<128x128xf32>
    %cst_92 = arith.constant dense<0.000000e+00> : vector<2x128xf32>
    %179 = tpu.matmul %158, %178, %cst_92 {dimension_numbers = #tpu.dot_dimension_numbers<[1], [0], [0], [1], [0, 0, 1, 1], [], []>} : vector<2x128xf32>, vector<128x128xf32>, vector<2x128xf32> -> vector<2x128xf32>
    %180 = arith.addf %177, %179 : vector<2x128xf32>
    %181 = vector.broadcast %6 : vector<1x128xf32> to vector<2x128xf32>
    %182 = arith.addf %180, %181 : vector<2x128xf32>
    %183 = math.tanh %182 : vector<2x128xf32>
    %cst_93 = arith.constant 5.000000e-01 : f32
    %184 = vector.broadcast %cst_93 : f32 to vector<2x128xf32>
    %185 = arith.mulf %184, %183 : vector<2x128xf32>
    %cst_94 = arith.constant 5.000000e-01 : f32
    %186 = vector.broadcast %cst_94 : f32 to vector<2x128xf32>
    %187 = arith.addf %185, %186 : vector<2x128xf32>
    %c96_i32_95 = arith.constant 96 : i32
    %188 = tpu.dynamic_rotate %187 by %c96_i32_95 dim 1 : vector<2x128xf32>, i32 -> vector<2x128xf32>
    %c64_i32_96 = arith.constant 64 : i32
    %189 = tpu.dynamic_rotate %183 by %c64_i32_96 dim 1 : vector<2x128xf32>, i32 -> vector<2x128xf32>
    %c32_i32_97 = arith.constant 32 : i32
    %190 = tpu.dynamic_rotate %187 by %c32_i32_97 dim 1 : vector<2x128xf32>, i32 -> vector<2x128xf32>
    %191 = arith.mulf %188, %156 : vector<2x128xf32>
    %192 = arith.mulf %187, %189 : vector<2x128xf32>
    %193 = arith.addf %191, %192 : vector<2x128xf32>
    %194 = math.tanh %193 : vector<2x128xf32>
    %195 = arith.mulf %190, %194 : vector<2x128xf32>
    %196 = vector.extract_strided_slice %5 {offsets = [10, 0], sizes = [2, 128], strides = [1, 1]} : vector<16x128xf32> to vector<2x128xf32>
    %c8_98 = arith.constant 8 : index
    %c0_99 = arith.constant 0 : index
    %197 = vector.load %arg1[%c8_98, %c0_99] : memref<424x128xf32, #tpu.memory_space<vmem>>, vector<128x128xf32>
    %cst_100 = arith.constant dense<0.000000e+00> : vector<2x128xf32>
    %198 = tpu.matmul %175, %197, %cst_100 {dimension_numbers = #tpu.dot_dimension_numbers<[1], [0], [0], [1], [0, 0, 1, 1], [], []>} : vector<2x128xf32>, vector<128x128xf32>, vector<2x128xf32> -> vector<2x128xf32>
    %199 = arith.addf %196, %198 : vector<2x128xf32>
    %200 = math.tanh %199 : vector<2x128xf32>
    %cst_101 = arith.constant 5.000000e-01 : f32
    %201 = vector.broadcast %cst_101 : f32 to vector<2x128xf32>
    %202 = arith.mulf %201, %200 : vector<2x128xf32>
    %cst_102 = arith.constant 5.000000e-01 : f32
    %203 = vector.broadcast %cst_102 : f32 to vector<2x128xf32>
    %204 = arith.addf %202, %203 : vector<2x128xf32>
    %c96_i32_103 = arith.constant 96 : i32
    %205 = tpu.dynamic_rotate %204 by %c96_i32_103 dim 1 : vector<2x128xf32>, i32 -> vector<2x128xf32>
    %c64_i32_104 = arith.constant 64 : i32
    %206 = tpu.dynamic_rotate %200 by %c64_i32_104 dim 1 : vector<2x128xf32>, i32 -> vector<2x128xf32>
    %c32_i32_105 = arith.constant 32 : i32
    %207 = tpu.dynamic_rotate %204 by %c32_i32_105 dim 1 : vector<2x128xf32>, i32 -> vector<2x128xf32>
    %208 = arith.mulf %205, %173 : vector<2x128xf32>
    %209 = arith.mulf %204, %206 : vector<2x128xf32>
    %210 = arith.addf %208, %209 : vector<2x128xf32>
    %211 = math.tanh %210 : vector<2x128xf32>
    %212 = arith.mulf %207, %211 : vector<2x128xf32>
    %c144_106 = arith.constant 144 : index
    %c0_107 = arith.constant 0 : index
    %213 = vector.load %arg1[%c144_106, %c0_107] : memref<424x128xf32, #tpu.memory_space<vmem>>, vector<128x128xf32>
    %cst_108 = arith.constant dense<0.000000e+00> : vector<2x128xf32>
    %214 = tpu.matmul %212, %213, %cst_108 {dimension_numbers = #tpu.dot_dimension_numbers<[1], [0], [0], [1], [0, 0, 1, 1], [], []>} : vector<2x128xf32>, vector<128x128xf32>, vector<2x128xf32> -> vector<2x128xf32>
    %c272_109 = arith.constant 272 : index
    %c0_110 = arith.constant 0 : index
    %215 = vector.load %arg1[%c272_109, %c0_110] : memref<424x128xf32, #tpu.memory_space<vmem>>, vector<128x128xf32>
    %cst_111 = arith.constant dense<0.000000e+00> : vector<2x128xf32>
    %216 = tpu.matmul %195, %215, %cst_111 {dimension_numbers = #tpu.dot_dimension_numbers<[1], [0], [0], [1], [0, 0, 1, 1], [], []>} : vector<2x128xf32>, vector<128x128xf32>, vector<2x128xf32> -> vector<2x128xf32>
    %217 = arith.addf %214, %216 : vector<2x128xf32>
    %218 = vector.broadcast %6 : vector<1x128xf32> to vector<2x128xf32>
    %219 = arith.addf %217, %218 : vector<2x128xf32>
    %220 = math.tanh %219 : vector<2x128xf32>
    %cst_112 = arith.constant 5.000000e-01 : f32
    %221 = vector.broadcast %cst_112 : f32 to vector<2x128xf32>
    %222 = arith.mulf %221, %220 : vector<2x128xf32>
    %cst_113 = arith.constant 5.000000e-01 : f32
    %223 = vector.broadcast %cst_113 : f32 to vector<2x128xf32>
    %224 = arith.addf %222, %223 : vector<2x128xf32>
    %c96_i32_114 = arith.constant 96 : i32
    %225 = tpu.dynamic_rotate %224 by %c96_i32_114 dim 1 : vector<2x128xf32>, i32 -> vector<2x128xf32>
    %c64_i32_115 = arith.constant 64 : i32
    %226 = tpu.dynamic_rotate %220 by %c64_i32_115 dim 1 : vector<2x128xf32>, i32 -> vector<2x128xf32>
    %c32_i32_116 = arith.constant 32 : i32
    %227 = tpu.dynamic_rotate %224 by %c32_i32_116 dim 1 : vector<2x128xf32>, i32 -> vector<2x128xf32>
    %228 = arith.mulf %225, %193 : vector<2x128xf32>
    %229 = arith.mulf %224, %226 : vector<2x128xf32>
    %230 = arith.addf %228, %229 : vector<2x128xf32>
    %231 = math.tanh %230 : vector<2x128xf32>
    %232 = arith.mulf %227, %231 : vector<2x128xf32>
    %233 = vector.extract_strided_slice %5 {offsets = [12, 0], sizes = [2, 128], strides = [1, 1]} : vector<16x128xf32> to vector<2x128xf32>
    %c8_117 = arith.constant 8 : index
    %c0_118 = arith.constant 0 : index
    %234 = vector.load %arg1[%c8_117, %c0_118] : memref<424x128xf32, #tpu.memory_space<vmem>>, vector<128x128xf32>
    %cst_119 = arith.constant dense<0.000000e+00> : vector<2x128xf32>
    %235 = tpu.matmul %212, %234, %cst_119 {dimension_numbers = #tpu.dot_dimension_numbers<[1], [0], [0], [1], [0, 0, 1, 1], [], []>} : vector<2x128xf32>, vector<128x128xf32>, vector<2x128xf32> -> vector<2x128xf32>
    %236 = arith.addf %233, %235 : vector<2x128xf32>
    %237 = math.tanh %236 : vector<2x128xf32>
    %cst_120 = arith.constant 5.000000e-01 : f32
    %238 = vector.broadcast %cst_120 : f32 to vector<2x128xf32>
    %239 = arith.mulf %238, %237 : vector<2x128xf32>
    %cst_121 = arith.constant 5.000000e-01 : f32
    %240 = vector.broadcast %cst_121 : f32 to vector<2x128xf32>
    %241 = arith.addf %239, %240 : vector<2x128xf32>
    %c96_i32_122 = arith.constant 96 : i32
    %242 = tpu.dynamic_rotate %241 by %c96_i32_122 dim 1 : vector<2x128xf32>, i32 -> vector<2x128xf32>
    %c64_i32_123 = arith.constant 64 : i32
    %243 = tpu.dynamic_rotate %237 by %c64_i32_123 dim 1 : vector<2x128xf32>, i32 -> vector<2x128xf32>
    %c32_i32_124 = arith.constant 32 : i32
    %244 = tpu.dynamic_rotate %241 by %c32_i32_124 dim 1 : vector<2x128xf32>, i32 -> vector<2x128xf32>
    %245 = arith.mulf %242, %210 : vector<2x128xf32>
    %246 = arith.mulf %241, %243 : vector<2x128xf32>
    %247 = arith.addf %245, %246 : vector<2x128xf32>
    %248 = math.tanh %247 : vector<2x128xf32>
    %249 = arith.mulf %244, %248 : vector<2x128xf32>
    %c144_125 = arith.constant 144 : index
    %c0_126 = arith.constant 0 : index
    %250 = vector.load %arg1[%c144_125, %c0_126] : memref<424x128xf32, #tpu.memory_space<vmem>>, vector<128x128xf32>
    %cst_127 = arith.constant dense<0.000000e+00> : vector<2x128xf32>
    %251 = tpu.matmul %249, %250, %cst_127 {dimension_numbers = #tpu.dot_dimension_numbers<[1], [0], [0], [1], [0, 0, 1, 1], [], []>} : vector<2x128xf32>, vector<128x128xf32>, vector<2x128xf32> -> vector<2x128xf32>
    %c272_128 = arith.constant 272 : index
    %c0_129 = arith.constant 0 : index
    %252 = vector.load %arg1[%c272_128, %c0_129] : memref<424x128xf32, #tpu.memory_space<vmem>>, vector<128x128xf32>
    %cst_130 = arith.constant dense<0.000000e+00> : vector<2x128xf32>
    %253 = tpu.matmul %232, %252, %cst_130 {dimension_numbers = #tpu.dot_dimension_numbers<[1], [0], [0], [1], [0, 0, 1, 1], [], []>} : vector<2x128xf32>, vector<128x128xf32>, vector<2x128xf32> -> vector<2x128xf32>
    %254 = arith.addf %251, %253 : vector<2x128xf32>
    %255 = vector.broadcast %6 : vector<1x128xf32> to vector<2x128xf32>
    %256 = arith.addf %254, %255 : vector<2x128xf32>
    %257 = math.tanh %256 : vector<2x128xf32>
    %cst_131 = arith.constant 5.000000e-01 : f32
    %258 = vector.broadcast %cst_131 : f32 to vector<2x128xf32>
    %259 = arith.mulf %258, %257 : vector<2x128xf32>
    %cst_132 = arith.constant 5.000000e-01 : f32
    %260 = vector.broadcast %cst_132 : f32 to vector<2x128xf32>
    %261 = arith.addf %259, %260 : vector<2x128xf32>
    %c96_i32_133 = arith.constant 96 : i32
    %262 = tpu.dynamic_rotate %261 by %c96_i32_133 dim 1 : vector<2x128xf32>, i32 -> vector<2x128xf32>
    %c64_i32_134 = arith.constant 64 : i32
    %263 = tpu.dynamic_rotate %257 by %c64_i32_134 dim 1 : vector<2x128xf32>, i32 -> vector<2x128xf32>
    %c32_i32_135 = arith.constant 32 : i32
    %264 = tpu.dynamic_rotate %261 by %c32_i32_135 dim 1 : vector<2x128xf32>, i32 -> vector<2x128xf32>
    %265 = arith.mulf %262, %230 : vector<2x128xf32>
    %266 = arith.mulf %261, %263 : vector<2x128xf32>
    %267 = arith.addf %265, %266 : vector<2x128xf32>
    %268 = math.tanh %267 : vector<2x128xf32>
    %269 = arith.mulf %264, %268 : vector<2x128xf32>
    %270 = vector.extract_strided_slice %5 {offsets = [14, 0], sizes = [2, 128], strides = [1, 1]} : vector<16x128xf32> to vector<2x128xf32>
    %c8_136 = arith.constant 8 : index
    %c0_137 = arith.constant 0 : index
    %271 = vector.load %arg1[%c8_136, %c0_137] : memref<424x128xf32, #tpu.memory_space<vmem>>, vector<128x128xf32>
    %cst_138 = arith.constant dense<0.000000e+00> : vector<2x128xf32>
    %272 = tpu.matmul %249, %271, %cst_138 {dimension_numbers = #tpu.dot_dimension_numbers<[1], [0], [0], [1], [0, 0, 1, 1], [], []>} : vector<2x128xf32>, vector<128x128xf32>, vector<2x128xf32> -> vector<2x128xf32>
    %273 = arith.addf %270, %272 : vector<2x128xf32>
    %274 = math.tanh %273 : vector<2x128xf32>
    %cst_139 = arith.constant 5.000000e-01 : f32
    %275 = vector.broadcast %cst_139 : f32 to vector<2x128xf32>
    %276 = arith.mulf %275, %274 : vector<2x128xf32>
    %cst_140 = arith.constant 5.000000e-01 : f32
    %277 = vector.broadcast %cst_140 : f32 to vector<2x128xf32>
    %278 = arith.addf %276, %277 : vector<2x128xf32>
    %c96_i32_141 = arith.constant 96 : i32
    %279 = tpu.dynamic_rotate %278 by %c96_i32_141 dim 1 : vector<2x128xf32>, i32 -> vector<2x128xf32>
    %c64_i32_142 = arith.constant 64 : i32
    %280 = tpu.dynamic_rotate %274 by %c64_i32_142 dim 1 : vector<2x128xf32>, i32 -> vector<2x128xf32>
    %c32_i32_143 = arith.constant 32 : i32
    %281 = tpu.dynamic_rotate %278 by %c32_i32_143 dim 1 : vector<2x128xf32>, i32 -> vector<2x128xf32>
    %282 = arith.mulf %279, %247 : vector<2x128xf32>
    %283 = arith.mulf %278, %280 : vector<2x128xf32>
    %284 = arith.addf %282, %283 : vector<2x128xf32>
    %285 = math.tanh %284 : vector<2x128xf32>
    %286 = arith.mulf %281, %285 : vector<2x128xf32>
    %c144_144 = arith.constant 144 : index
    %c0_145 = arith.constant 0 : index
    %287 = vector.load %arg1[%c144_144, %c0_145] : memref<424x128xf32, #tpu.memory_space<vmem>>, vector<128x128xf32>
    %cst_146 = arith.constant dense<0.000000e+00> : vector<2x128xf32>
    %288 = tpu.matmul %286, %287, %cst_146 {dimension_numbers = #tpu.dot_dimension_numbers<[1], [0], [0], [1], [0, 0, 1, 1], [], []>} : vector<2x128xf32>, vector<128x128xf32>, vector<2x128xf32> -> vector<2x128xf32>
    %c272_147 = arith.constant 272 : index
    %c0_148 = arith.constant 0 : index
    %289 = vector.load %arg1[%c272_147, %c0_148] : memref<424x128xf32, #tpu.memory_space<vmem>>, vector<128x128xf32>
    %cst_149 = arith.constant dense<0.000000e+00> : vector<2x128xf32>
    %290 = tpu.matmul %269, %289, %cst_149 {dimension_numbers = #tpu.dot_dimension_numbers<[1], [0], [0], [1], [0, 0, 1, 1], [], []>} : vector<2x128xf32>, vector<128x128xf32>, vector<2x128xf32> -> vector<2x128xf32>
    %291 = arith.addf %288, %290 : vector<2x128xf32>
    %292 = vector.broadcast %6 : vector<1x128xf32> to vector<2x128xf32>
    %293 = arith.addf %291, %292 : vector<2x128xf32>
    %294 = math.tanh %293 : vector<2x128xf32>
    %cst_150 = arith.constant 5.000000e-01 : f32
    %295 = vector.broadcast %cst_150 : f32 to vector<2x128xf32>
    %296 = arith.mulf %295, %294 : vector<2x128xf32>
    %cst_151 = arith.constant 5.000000e-01 : f32
    %297 = vector.broadcast %cst_151 : f32 to vector<2x128xf32>
    %298 = arith.addf %296, %297 : vector<2x128xf32>
    %c96_i32_152 = arith.constant 96 : i32
    %299 = tpu.dynamic_rotate %298 by %c96_i32_152 dim 1 : vector<2x128xf32>, i32 -> vector<2x128xf32>
    %c64_i32_153 = arith.constant 64 : i32
    %300 = tpu.dynamic_rotate %294 by %c64_i32_153 dim 1 : vector<2x128xf32>, i32 -> vector<2x128xf32>
    %c32_i32_154 = arith.constant 32 : i32
    %301 = tpu.dynamic_rotate %298 by %c32_i32_154 dim 1 : vector<2x128xf32>, i32 -> vector<2x128xf32>
    %302 = arith.mulf %299, %267 : vector<2x128xf32>
    %303 = arith.mulf %298, %300 : vector<2x128xf32>
    %304 = arith.addf %302, %303 : vector<2x128xf32>
    %305 = math.tanh %304 : vector<2x128xf32>
    %306 = arith.mulf %301, %305 : vector<2x128xf32>
    %c408 = arith.constant 408 : index
    %c0_155 = arith.constant 0 : index
    %307 = vector.load %arg1[%c408, %c0_155] : memref<424x128xf32, #tpu.memory_space<vmem>>, vector<1x128xf32>
    %c416 = arith.constant 416 : index
    %c0_156 = arith.constant 0 : index
    %308 = vector.load %arg1[%c416, %c0_156] : memref<424x128xf32, #tpu.memory_space<vmem>>, vector<1x1xf32>
    %309 = vector.broadcast %307 : vector<1x128xf32> to vector<2x128xf32>
    %310 = arith.mulf %306, %309 : vector<2x128xf32>
    %cst_157 = arith.constant dense<0.000000e+00> : vector<2xf32>
    %311 = vector.multi_reduction <add>, %310, %cst_157 [1] : vector<2x128xf32> to vector<2xf32>
    %312 = vector.shape_cast %311 : vector<2xf32> to vector<2x1xf32>
    %313 = vector.broadcast %308 : vector<1x1xf32> to vector<2x1xf32>
    %314 = arith.addf %312, %313 : vector<2x1xf32>
    %c0_158 = arith.constant 0 : index
    %c0_159 = arith.constant 0 : index
    %315 = vector.load %arg2[%c0_158, %c0_159] : memref<2x1xf32, #tpu.memory_space<vmem>>, vector<2x1xf32>
    tpu.vector_store %arg2[%c0_158, %c0_159], %314 {strides = array<i32>} : memref<2x1xf32, #tpu.memory_space<vmem>>, vector<2x1xf32>,
    return
  }
}

</mosaic_0001>

<bundles_post_ra>
// kernel: tpu_custom_call.1
= control target key start
LH: loop header
LB: loop body
LE: loop exit
PB: predicated region body
PF: predicated region fallthrough
CT: control target
= control target key end

     0   :  { %7 = vsyncpa [#allocation3], 0  ;;  %s4142_s9 = smov [#allocation2]   ;;  %s4789_s0 = inlined_call_operand.vmem [shape: f32[16,4], index: 0, kind: input, shape index: {}]   ;;  %s4790_s1 = inlined_call_operand.hbm [shape: f32[424,128], index: 1, kind: input, shape index: {}]   ;;  %s4791_s2 = inlined_call_operand.vmem [shape: f32[2,1], index: 2, kind: output, shape index: {}]  }
   0x1   :  { %s15_s10 = sshll.u32 %s4142_s9, 4  ;;  %s4118_s13 = scalar_lea.hbm %s4790_s1, 6784  ;;  %s16_s10 = int_to_ptr.vmem [resolvable:$true] %s15_s10 }
   0x2   :  { %p4119_p0 = scmp.ne.s32.totalorder %s4790_s1, %s4118_s13  ;;  %p4122_p1 = scmp.lt.u32.totalorder %s4118_s13, %s4790_s1 }
   0x4   :  { %p4124_p2 = pnand %p4122_p1, %p4119_p0 }
   0x6   :  { %4127 = shalt.err (!%p4124_p2)
}
   0x7   :  { %s4128_s18 = scalar_lea.vmem %s16_s10, 6784  ;;  %p4133_p4 = scmp.lt.s32.totalorder %s16_s10, %s16_s10 }
   0x8   :  { %p4129_p3 = scmp.ne.s32.totalorder %s16_s10, %s4128_s18  ;;  %p4134_p5 = scmp.lt.s32.totalorder %s4128_s18, %s4128_s18 }
   0xa   :  { %p4135_p6 = por %p4134_p5, %p4133_p4 }
   0xc   :  { %p4136_p7 = pnand %p4135_p6, %p4129_p3 }
   0xe   :  { %4139 = shalt.err (!%p4136_p7)
}
   0xf   :  { %s4143_s19 = smov 128   ;;  %s4144_s20 = smov 8  }
  0x10   :  { %21 = dma.hbm_to_vmem [thread:$0]  %s4790_s1, 6784, %s16_s10, [#allocation3], %s4143_s19, %s4143_s19, %s4144_s20  }
  0x11   :  { %4140 = dma.done.wait [#allocation3], 6784  }
  0x12   :  { %4141 = vsyncadd [#allocation3], 4294960512  ;;  %v4145_v0 = vmov 0.0|0.0   ;;  %vm4146_vm0 = vmmov 0   ;;  %v4147_v1 = vmov 0.0   ;;  %v120_v2 = vld [vmem:[#allocation2 + $0x8] sm:$0xff] }
  0x13   :  { %3468 = vmatprep.subr.bf16.mxu1 %v4145_v0  ;;  %2660 = vmatprep.mubr.msk.f32.mxu1 %vm4146_vm0, %v4147_v1  ;;  %v121_v3 = vld [vmem:[#allocation2 + $0x10] sm:$0xff]  ;;  %v122_v4 = vld [vmem:[#allocation2 + $0x18] sm:$0xff]  ;;  %v123_v6 = vld [vmem:[#allocation2 + $0x20] sm:$0xff]  ;;  %vm40_vm1 = vcmask 1043456   ;;  %vm33_vm2 = vcmask 31744   ;;  %s4149_s26 = smov 96  }
  0x14   :  { %v4181_v5 = vpack.c.bf16 %v121_v3, %v120_v2  ;;  %v4184_v7 = vpack.c.bf16 %v123_v6, %v122_v4  ;;  %v124_v8 = vld [vmem:[#allocation2 + $0x28] sm:$0xff]  ;;  %v125_v9 = vld [vmem:[#allocation2 + $0x30] sm:$0xff]  ;;  %v25_v10 = vld [vmem:[#allocation2] sm:$0xf]  ;;  %s4150_s27 = smov 64   ;;  %vm2189_vm3 = vcmask 1041408  }
  0x15   :  { %2623 = vmatprep.subr.msk.mxu0 %vm40_vm1, %v25_v10  ;;  %v27_v11 = vld [vmem:[%s4789_s0] sm:$0xff]  ;;  %v28_v12 = vld [vmem:[%s4789_s0 + $0x8] sm:$0xff]  ;;  %v4194_v13 = vpack.c.bf16 %v125_v9, %v124_v8  ;;  %v126_v14 = vld [vmem:[#allocation2 + $0x38] sm:$0xff]  ;;  %s4148_s0 = smov 32   ;;  %vm2198_vm4 = vcmask 1024  }
  0x16   :  { %3470 = vmatpush3.bf16.msra.mxu1 %v4181_v5  ;;  %2624 = vmatpush3.msk.msra.mxu0 %vm40_vm1, %v25_v10  ;;  %v127_v15 = vld [vmem:[#allocation2 + $0x40] sm:$0xff]  ;;  %v128_v17 = vld [vmem:[#allocation2 + $0x48] sm:$0xff]  ;;  %v129_v18 = vld [vmem:[#allocation2 + $0x50] sm:$0xff] }
  0x17   :  { %3471 = vmatprep.subr.bf16.mxu1 %v4145_v0  ;;  %2625 = vmatprep.mubr.msk.f32.mxu0 %vm33_vm2, %v27_v11  ;;  %v4201_v16 = vpack.c.bf16 %v127_v15, %v126_v14  ;;  %v4205_v19 = vpack.c.bf16 %v129_v18, %v128_v17  ;;  %v130_v20 = vld [vmem:[#allocation2 + $0x58] sm:$0xff]  ;;  %v131_v21 = vld [vmem:[#allocation2 + $0x60] sm:$0xff]  ;;  %v132_v23 = vld [vmem:[#allocation2 + $0x68] sm:$0xff] }
  0x18   :  { %2626 = vmatmul.mubr.msk.f32.vlgmr.msra.gmra.mrb[0].mxu0 %vm33_vm2, %v28_v12  ;;  %3492 = vmatprep.subr.bf16.mxu0 %v4145_v0  ;;  %v4209_v22 = vpack.c.bf16 %v131_v21, %v130_v20  ;;  %v133_v24 = vld [vmem:[#allocation2 + $0x70] sm:$0xff]  ;;  %v134_v26 = vld [vmem:[#allocation2 + $0x78] sm:$0xff]  ;;  %v135_v27 = vld [vmem:[#allocation2 + $0x80] sm:$0xff] }
  0x19   :  { %2695 = vmatprep.mubr.msk.f32.mxu0 %vm4146_vm0, %v4147_v1  ;;  %v4213_v25 = vpack.c.bf16 %v133_v24, %v132_v23  ;;  %v4217_v28 = vpack.c.bf16 %v135_v27, %v134_v26  ;;  %v237_v29 = vld [vmem:[#allocation2 + $0x110] sm:$0xff]  ;;  %v238_v30 = vld [vmem:[#allocation2 + $0x118] sm:$0xff]  ;;  %v239_v31 = vld [vmem:[#allocation2 + $0x120] sm:$0xff] }
  0x1a   :  { %3473 = vmatpush3.bf16.msra.mxu1 %v4184_v7  ;;  %v4225_v32 = vpack.c.bf16 %v238_v30, %v237_v29  ;;  %v240_v33 = vld [vmem:[#allocation2 + $0x128] sm:$0xff]  ;;  %v241_v35 = vld [vmem:[#allocation2 + $0x130] sm:$0xff]  ;;  %v242_v36 = vld [vmem:[#allocation2 + $0x138] sm:$0xff] }
  0x1b   :  { %3474 = vmatprep.subr.bf16.mxu1 %v4145_v0  ;;  %v4228_v34 = vpack.c.bf16 %v240_v33, %v239_v31  ;;  %v221_v37 = vld [vmem:[#allocation2 + $0x90] sm:$0xff]  ;;  %v222_v38 = vld [vmem:[#allocation2 + $0x98] sm:$0xff]  ;;  %v223_v40 = vld [vmem:[#allocation2 + $0xa0] sm:$0xff]  ;;  %v4234_v42 = vpack.c.bf16 %v242_v36, %v241_v35 }
  0x1c   :  { %3494 = vmatpush3.bf16.msra.mxu0 %v4225_v32  ;;  %v4231_v39 = vpack.c.bf16 %v222_v38, %v221_v37  ;;  %v224_v41 = vld [vmem:[#allocation2 + $0xa8] sm:$0xff]  ;;  %v243_v43 = vld [vmem:[#allocation2 + $0x140] sm:$0xff]  ;;  %v225_v46 = vld [vmem:[#allocation2 + $0xb0] sm:$0xff] }
  0x1d   :  { %3495 = vmatprep.subr.bf16.mxu0 %v4145_v0  ;;  %v244_v44 = vld [vmem:[#allocation2 + $0x148] sm:$0xff]  ;;  %v4238_v45 = vpack.c.bf16 %v224_v41, %v223_v40  ;;  %v226_v47 = vld [vmem:[#allocation2 + $0xb8] sm:$0xff]  ;;  %v245_v49 = vld [vmem:[#allocation2 + $0x150] sm:$0xff] }
  0x1e   :  { %3476 = vmatpush3.bf16.msra.mxu1 %v4194_v13  ;;  %v4242_v48 = vpack.c.bf16 %v244_v44, %v243_v43  ;;  %v246_v50 = vld [vmem:[#allocation2 + $0x158] sm:$0xff]  ;;  %v4246_v51 = vpack.c.bf16 %v226_v47, %v225_v46  ;;  %v247_v53 = vld [vmem:[#allocation2 + $0x160] sm:$0xff]  ;;  %v248_v54 = vld [vmem:[#allocation2 + $0x168] sm:$0xff] }
  0x1f   :  { %3477 = vmatprep.subr.bf16.mxu1 %v4145_v0  ;;  %v4250_v52 = vpack.c.bf16 %v246_v50, %v245_v49  ;;  %v4256_v55 = vpack.c.bf16 %v248_v54, %v247_v53  ;;  %v249_v56 = vld [vmem:[#allocation2 + $0x170] sm:$0xff]  ;;  %v250_v57 = vld [vmem:[#allocation2 + $0x178] sm:$0xff]  ;;  %v251_v59 = vld [vmem:[#allocation2 + $0x180] sm:$0xff] }
  0x20   :  { %3497 = vmatpush3.bf16.msra.mxu0 %v4228_v34  ;;  %v4260_v58 = vpack.c.bf16 %v250_v57, %v249_v56  ;;  %v252_v60 = vld [vmem:[#allocation2 + $0x188] sm:$0xff]  ;;  %v227_v10 = vld [vmem:[#allocation2 + $0xc0] sm:$0xff]  ;;  %v229_v14 = vld [vmem:[#allocation2 + $0xd0] sm:$0xff] }
  0x21   :  { %3498 = vmatprep.subr.bf16.mxu0 %v4145_v0  ;;  %v4264_v61 = vpack.c.bf16 %v252_v60, %v251_v59  ;;  %v2205_v62 = vld [vmem:[#allocation2 + $0x88] ss:$0 sm:$0xff]  ;;  %v230_v15 = vld [vmem:[#allocation2 + $0xd8] sm:$0xff]  ;;  %v231_v18 = vld [vmem:[#allocation2 + $0xe0] sm:$0xff] }
  0x22   :  { %3479 = vmatpush3.bf16.msra.mxu1 %v4201_v16  ;;  %v228_v11 = vld [vmem:[#allocation2 + $0xc8] sm:$0xff]  ;;  %v4297_v17 = vpack.c.bf16 %v230_v15, %v229_v14  ;;  %v233_v24 = vld [vmem:[#allocation2 + $0xf0] sm:$0xff]  ;;  %v234_v26 = vld [vmem:[#allocation2 + $0xf8] sm:$0xff] }
  0x23   :  { %3480 = vmatprep.subr.bf16.mxu1 %v4145_v0  ;;  %v4293_v12 = vpack.c.bf16 %v228_v11, %v227_v10  ;;  %v232_v20 = vld [vmem:[#allocation2 + $0xe8] sm:$0xff]  ;;  %v4304_v29 = vpack.c.bf16 %v234_v26, %v233_v24  ;;  %v235_v31 = vld [vmem:[#allocation2 + $0x100] sm:$0xff]  ;;  %v4355_v50 = vld [vmem:[#allocation2 + $0x190] ss:$0 sm:$0xff] }
  0x24   :  { %3500 = vmatpush3.bf16.msra.mxu0 %v4234_v42  ;;  %v4301_v23 = vpack.c.bf16 %v232_v20, %v231_v18  ;;  %v236_v33 = vld [vmem:[#allocation2 + $0x108] sm:$0xff] }
  0x25   :  { %3501 = vmatprep.subr.bf16.mxu0 %v4145_v0  ;;  %v4310_v35 = vpack.c.bf16 %v236_v33, %v235_v31 }
  0x26   :  { %3482 = vmatpush3.bf16.msra.mxu1 %v4205_v19 }
  0x27   :  { %3483 = vmatprep.subr.bf16.mxu1 %v4145_v0 }
  0x28   :  { %3503 = vmatpush3.bf16.msra.mxu0 %v4242_v48 }
  0x29   :  { %3504 = vmatprep.subr.bf16.mxu0 %v4145_v0 }
  0x2a   :  { %3485 = vmatpush3.bf16.msra.mxu1 %v4209_v22 }
  0x2b   :  { %3486 = vmatprep.subr.bf16.mxu1 %v4145_v0 }
  0x2c   :  { %3506 = vmatpush3.bf16.msra.mxu0 %v4250_v52 }
  0x2d   :  { %3507 = vmatprep.subr.bf16.mxu0 %v4145_v0 }
  0x2e   :  { %3488 = vmatpush3.bf16.msra.mxu1 %v4213_v25 }
  0x2f   :  { %3489 = vmatprep.subr.bf16.mxu1 %v4145_v0 }
  0x30   :  { %3509 = vmatpush3.bf16.msra.mxu0 %v4256_v55 }
  0x31   :  { %3510 = vmatprep.subr.bf16.mxu0 %v4145_v0 }
  0x32   :  { %3491 = vmatpush3.bf16.msra.mxu1 %v4217_v28 }
  0x33   :  { %3516 = vmatprep.subr.bf16.mxu1 %v4145_v0 }
  0x34   :  { %3512 = vmatpush3.bf16.msra.mxu0 %v4260_v58 }
  0x35   :  { %2661 = vmatmul.mubr.f32.vlgmr.msra.gmra.mrb[0].mxu1 %v4147_v1  ;;  %3513 = vmatprep.subr.bf16.mxu0 %v4145_v0 }
  0x36   :  { %2730 = vmatprep.mubr.msk.f32.mxu1 %vm4146_vm0, %v4147_v1  ;;  %3518 = vmatpush3.bf16.msra.mxu1 %v4231_v39 }
  0x37   :  { %3519 = vmatprep.subr.bf16.mxu1 %v4145_v0 }
  0x38   :  { %3515 = vmatpush3.bf16.msra.mxu0 %v4264_v61 }
  0x39   :  { %3540 = vmatprep.subr.bf16.mxu0 %v4145_v0 }
  0x3a   :  { %3521 = vmatpush3.bf16.msra.mxu1 %v4238_v45 }
  0x3b   :  { %3522 = vmatprep.subr.bf16.mxu1 %v4145_v0  ;;  %2696 = vmatmul.mubr.f32.vlgmr.msra.gmra.mrb[2].mxu0 %v4147_v1 }
  0x3c   :  { %3542 = vmatpush3.bf16.msra.mxu0 %v4181_v5  ;;  %2765 = vmatprep.mubr.msk.f32.mxu0 %vm4146_vm0, %v4147_v1 }
  0x3d   :  { %3543 = vmatprep.subr.bf16.mxu0 %v4145_v0 }
  0x3e   :  { %3524 = vmatpush3.bf16.msra.mxu1 %v4246_v51 }
  0x3f   :  { %3525 = vmatprep.subr.bf16.mxu1 %v4145_v0 }
  0x40   :  { %3545 = vmatpush3.bf16.msra.mxu0 %v4184_v7 }
  0x41   :  { %3546 = vmatprep.subr.bf16.mxu0 %v4145_v0 }
  0x42   :  { %3527 = vmatpush3.bf16.msra.mxu1 %v4293_v12 }
  0x43   :  { %3528 = vmatprep.subr.bf16.mxu1 %v4145_v0 }
  0x44   :  { %3548 = vmatpush3.bf16.msra.mxu0 %v4194_v13 }
  0x45   :  { %3549 = vmatprep.subr.bf16.mxu0 %v4145_v0 }
  0x46   :  { %3530 = vmatpush3.bf16.msra.mxu1 %v4297_v17 }
  0x47   :  { %3531 = vmatprep.subr.bf16.mxu1 %v4145_v0 }
  0x48   :  { %3551 = vmatpush3.bf16.msra.mxu0 %v4201_v16 }
  0x49   :  { %3552 = vmatprep.subr.bf16.mxu0 %v4145_v0 }
  0x4a   :  { %3533 = vmatpush3.bf16.msra.mxu1 %v4301_v23 }
  0x4b   :  { %3534 = vmatprep.subr.bf16.mxu1 %v4145_v0 }
  0x4c   :  { %3554 = vmatpush3.bf16.msra.mxu0 %v4205_v19 }
  0x4d   :  { %3555 = vmatprep.subr.bf16.mxu0 %v4145_v0 }
  0x4e   :  { %3536 = vmatpush3.bf16.msra.mxu1 %v4304_v29 }
  0x4f   :  { %3537 = vmatprep.subr.bf16.mxu1 %v4145_v0 }
  0x50   :  { %3557 = vmatpush3.bf16.msra.mxu0 %v4209_v22 }
  0x51   :  { %3558 = vmatprep.subr.bf16.mxu0 %v4145_v0 }
  0x52   :  { %3539 = vmatpush3.bf16.msra.mxu1 %v4310_v35 }
  0x53   :  { %3564 = vmatprep.subr.bf16.mxu1 %v4145_v0 }
  0x54   :  { %3560 = vmatpush3.bf16.msra.mxu0 %v4213_v25 }
  0x55   :  { %3561 = vmatprep.subr.bf16.mxu0 %v4145_v0 }
  0x58   :  { %3563 = vmatpush3.bf16.msra.mxu0 %v4217_v28 }
  0x59   :  { %3588 = vmatprep.subr.bf16.mxu0 %v4145_v0 }
  0xeb   :  { %v2627_v63 = vpop.f32.mrb[0].mxu0 }
  0xec   :  { %v4288_v2 = vadd.f32 %v2627_v63, %v2205_v62  ;;  %v110_v3 = vpop.f32.mrb[1].mxu0 }
  0xed   :  { %v4290_v4 = vadd.f32 %v2205_v62, %v110_v3 }
 0x108   :  { %v202_v6 = vpop.f32.mrb[0].mxu1 }
 0x109   :  { %v206_v8 = vadd.f32 %v202_v6, %v4290_v4  ;;  %v2662_v9 = vpop.f32.mrb[1].mxu1 }
 0x10b   :  { %4053 = vtanh.f32 %v206_v8 }
 0x10e   :  { %v319_v43 = vpop.f32.mrb[2].mxu0 }
 0x10f   :  { %v2697_v44 = vpop.f32.mrb[3].mxu0 }
 0x115   :  { %v4054_v21 = vpop.eup %4053 }
 0x116   :  { %v208_v27 = vmul.f32 0.5, %v4054_v21 }
 0x118   :  { %v209_v30 = vadd.f32 0.5, %v208_v27 }
 0x11a   :  { %214 = vrot.lane.b32.xlu1 %v209_v30, %s4148_s0  ;;  %210 = vrot.lane.b32.xlu0 %v209_v30, %s4149_s26 }
 0x11e   :  { %212 = vrot.lane.b32.xlu0 %v4054_v21, %s4150_s27 }
 0x18c   :  { %v211_v36 = vpop.permute.xlu0 %210  ;;  %v215_v47 = vpop.permute.xlu1 %214 }
 0x18d   :  { %v216_v38 = vmul.f32 0.0, %v211_v36 }
 0x190   :  { %v213_v37 = vpop.permute.xlu0 %212 }
 0x191   :  { %v217_v40 = vmul.f32 %v213_v37, %v209_v30 }
 0x193   :  { %v4316_v41 = vadd.f32 %v217_v40, %v216_v38 }
 0x195   :  { %4055 = vtanh.f32 %v4316_v41 }
 0x19f   :  { %v4056_v46 = vpop.eup %4055 }
 0x1a0   :  { %v220_v49 = vmul.f32 %v4056_v46, %v215_v47 }
 0x1a2   :  { %2731 = vmatmul.mubr.f32.vlgmr.msra.gmra.mrb[2].mxu1 %v220_v49  ;;  %2766 = vmatmul.mubr.f32.vlgmr.msra.gmra.mrb[4].mxu0 %v220_v49 }
 0x1a3   :  { %3566 = vmatpush3.bf16.msra.mxu1 %v4225_v32  ;;  %3590 = vmatpush3.bf16.msra.mxu0 %v4231_v39 }
 0x1a4   :  { %3567 = vmatprep.subr.bf16.mxu1 %v4145_v0  ;;  %3591 = vmatprep.subr.bf16.mxu0 %v4145_v0 }
 0x1a5   :  { %2800 = vmatprep.mubr.msk.f32.mxu1 %vm4146_vm0, %v4147_v1  ;;  %2835 = vmatprep.mubr.msk.f32.mxu0 %vm4146_vm0, %v4147_v1 }
 0x1a7   :  { %3569 = vmatpush3.bf16.msra.mxu1 %v4228_v34  ;;  %3593 = vmatpush3.bf16.msra.mxu0 %v4238_v45 }
 0x1a8   :  { %3570 = vmatprep.subr.bf16.mxu1 %v4145_v0  ;;  %3594 = vmatprep.subr.bf16.mxu0 %v4145_v0 }
 0x1ab   :  { %3572 = vmatpush3.bf16.msra.mxu1 %v4234_v42  ;;  %3596 = vmatpush3.bf16.msra.mxu0 %v4246_v51 }
 0x1ac   :  { %3573 = vmatprep.subr.bf16.mxu1 %v4145_v0  ;;  %3597 = vmatprep.subr.bf16.mxu0 %v4145_v0 }
 0x1af   :  { %3575 = vmatpush3.bf16.msra.mxu1 %v4242_v48  ;;  %3599 = vmatpush3.bf16.msra.mxu0 %v4293_v12 }
 0x1b0   :  { %3576 = vmatprep.subr.bf16.mxu1 %v4145_v0  ;;  %3600 = vmatprep.subr.bf16.mxu0 %v4145_v0 }
 0x1b3   :  { %3578 = vmatpush3.bf16.msra.mxu1 %v4250_v52  ;;  %3602 = vmatpush3.bf16.msra.mxu0 %v4297_v17 }
 0x1b4   :  { %3579 = vmatprep.subr.bf16.mxu1 %v4145_v0  ;;  %3603 = vmatprep.subr.bf16.mxu0 %v4145_v0 }
 0x1b7   :  { %3581 = vmatpush3.bf16.msra.mxu1 %v4256_v55  ;;  %3605 = vmatpush3.bf16.msra.mxu0 %v4301_v23 }
 0x1b8   :  { %3582 = vmatprep.subr.bf16.mxu1 %v4145_v0  ;;  %3606 = vmatprep.subr.bf16.mxu0 %v4145_v0 }
 0x1bb   :  { %3584 = vmatpush3.bf16.msra.mxu1 %v4260_v58  ;;  %3608 = vmatpush3.bf16.msra.mxu0 %v4304_v29 }
 0x1bc   :  { %3585 = vmatprep.subr.bf16.mxu1 %v4145_v0  ;;  %3609 = vmatprep.subr.bf16.mxu0 %v4145_v0 }
 0x1bf   :  { %3587 = vmatpush3.bf16.msra.mxu1 %v4264_v61  ;;  %3611 = vmatpush3.bf16.msra.mxu0 %v4310_v35 }
 0x1c0   :  { %3612 = vmatprep.subr.bf16.mxu1 %v4145_v0  ;;  %3636 = vmatprep.subr.bf16.mxu0 %v4145_v0 }
 0x275   :  { %v389_v53 = vpop.f32.mrb[2].mxu1  ;;  %v478_v54 = vpop.f32.mrb[4].mxu0 }
 0x276   :  { %v390_v56 = vadd.f32 %v389_v53, %v319_v43  ;;  %v483_v57 = vrot.slane %v478_v54, 6  ;;  %v2732_v59 = vpop.f32.mrb[3].mxu1  ;;  %v2767_v60 = vpop.f32.mrb[5].mxu0 }
 0x278   :  { %v397_v62 = vadd.f32 %v4355_v50, %v390_v56  ;;  %v485_v63 = vadd.f32 %v483_v57, %v4290_v4 }
 0x27a   :  { %4057 = vtanh.f32 %v397_v62 }
 0x27b   :  { %4059 = vtanh.f32 %v485_v63 }
 0x284   :  { %v4058_v3 = vpop.eup %4057 }
 0x285   :  { %v4060_v6 = vpop.eup %4059  ;;  %v399_v8 = vmul.f32 0.5, %v4058_v3 }
 0x286   :  { %v495_v9 = vrot.slane %v4060_v6, 2  ;;  %v487_v10 = vmul.f32 0.5, %v4060_v6 }
 0x287   :  { %v400_v11 = vadd.f32 0.5, %v399_v8 }
 0x288   :  { %497 = vrot.lane.b32.xlu1 %v495_v9, %s4150_s27  ;;  %v488_v14 = vadd.f32 0.5, %v487_v10 }
 0x289   :  { %401 = vrot.lane.b32.xlu0 %v400_v11, %s4149_s26 }
 0x28a   :  { %v490_v15 = vrot.slane %v488_v14, 2 }
 0x28c   :  { %403 = vrot.lane.b32.xlu1 %v4058_v3, %s4150_s27 }
 0x28d   :  { %492 = vrot.lane.b32.xlu0 %v490_v15, %s4149_s26 }
 0x290   :  { %405 = vrot.lane.b32.xlu1 %v400_v11, %s4148_s0 }
 0x291   :  { %499 = vrot.lane.b32.xlu0 %v490_v15, %s4148_s0 }
 0x2fa   :  { %v498_v18 = vpop.permute.xlu1 %497 }
 0x2fb   :  { %v503_v20 = vrot.slane %v498_v18, 6  ;;  %v402_v21 = vpop.permute.xlu0 %401 }
 0x2fc   :  { %v407_v27 = vmul.f32 0.0, %v402_v21 }
 0x2fd   :  { %v505_v24 = vmul.f32 %v503_v20, %v488_v14 }
 0x2fe   :  { %v404_v26 = vpop.permute.xlu1 %403 }
 0x2ff   :  { %v408_v30 = vmul.f32 %v404_v26, %v400_v11  ;;  %v493_v31 = vpop.permute.xlu0 %492  ;;  %v507_v33 = vrot.slane %v505_v24, 2 }
 0x300   :  { %v501_v36 = vmul.f32 %v493_v31, %v4316_v41 }
 0x301   :  { %v4366_v37 = vadd.f32 %v408_v30, %v407_v27 }
 0x302   :  { %v4368_v38 = vadd.f32 %v507_v33, %v501_v36  ;;  %v406_v43 = vpop.permute.xlu1 %405 }
 0x303   :  { %4061 = vtanh.f32 %v4366_v37  ;;  %v500_v47 = vpop.permute.xlu0 %499 }
 0x304   :  { %4063 = vtanh.f32 %v4368_v38 }
 0x30d   :  { %v4062_v40 = vpop.eup %4061 }
 0x30e   :  { %v4064_v44 = vpop.eup %4063  ;;  %v411_v46 = vmul.f32 %v4062_v40, %v406_v43 }
 0x30f   :  { %v511_v49 = vmul.f32 %v4064_v44, %v500_v47 }
 0x310   :  { %2801 = vmatmul.mubr.f32.vlgmr.msra.gmra.mrb[4].mxu1 %v411_v46 }
 0x311   :  { %3614 = vmatpush3.bf16.msra.mxu1 %v4181_v5  ;;  %2836 = vmatmul.mubr.f32.vlgmr.msra.gmra.mrb[6].mxu0 %v511_v49 }
 0x312   :  { %3615 = vmatprep.subr.bf16.mxu1 %v4145_v0  ;;  %2870 = vmatprep.mubr.msk.f32.mxu1 %vm4146_vm0, %v4147_v1 }
 0x313   :  { %3638 = vmatpush3.bf16.msra.mxu0 %v4225_v32  ;;  %2905 = vmatprep.mubr.msk.f32.mxu0 %vm4146_vm0, %v4147_v1 }
 0x314   :  { %3639 = vmatprep.subr.bf16.mxu0 %v4145_v0 }
 0x315   :  { %3617 = vmatpush3.bf16.msra.mxu1 %v4184_v7 }
 0x316   :  { %3618 = vmatprep.subr.bf16.mxu1 %v4145_v0 }
 0x317   :  { %3641 = vmatpush3.bf16.msra.mxu0 %v4228_v34 }
 0x318   :  { %3642 = vmatprep.subr.bf16.mxu0 %v4145_v0 }
 0x319   :  { %3620 = vmatpush3.bf16.msra.mxu1 %v4194_v13 }
 0x31a   :  { %3621 = vmatprep.subr.bf16.mxu1 %v4145_v0 }
 0x31b   :  { %3644 = vmatpush3.bf16.msra.mxu0 %v4234_v42 }
 0x31c   :  { %3645 = vmatprep.subr.bf16.mxu0 %v4145_v0 }
 0x31d   :  { %3623 = vmatpush3.bf16.msra.mxu1 %v4201_v16 }
 0x31e   :  { %3624 = vmatprep.subr.bf16.mxu1 %v4145_v0 }
 0x31f   :  { %3647 = vmatpush3.bf16.msra.mxu0 %v4242_v48 }
 0x320   :  { %3648 = vmatprep.subr.bf16.mxu0 %v4145_v0 }
 0x321   :  { %3626 = vmatpush3.bf16.msra.mxu1 %v4205_v19 }
 0x322   :  { %3627 = vmatprep.subr.bf16.mxu1 %v4145_v0 }
 0x323   :  { %3650 = vmatpush3.bf16.msra.mxu0 %v4250_v52 }
 0x324   :  { %3651 = vmatprep.subr.bf16.mxu0 %v4145_v0 }
 0x325   :  { %3629 = vmatpush3.bf16.msra.mxu1 %v4209_v22 }
 0x326   :  { %3630 = vmatprep.subr.bf16.mxu1 %v4145_v0 }
 0x327   :  { %3653 = vmatpush3.bf16.msra.mxu0 %v4256_v55 }
 0x328   :  { %3654 = vmatprep.subr.bf16.mxu0 %v4145_v0 }
 0x329   :  { %3632 = vmatpush3.bf16.msra.mxu1 %v4213_v25 }
 0x32a   :  { %3633 = vmatprep.subr.bf16.mxu1 %v4145_v0 }
 0x32b   :  { %3656 = vmatpush3.bf16.msra.mxu0 %v4260_v58 }
 0x32c   :  { %3657 = vmatprep.subr.bf16.mxu0 %v4145_v0 }
 0x32d   :  { %3635 = vmatpush3.bf16.msra.mxu1 %v4217_v28 }
 0x32e   :  { %3660 = vmatprep.subr.bf16.mxu1 %v4145_v0 }
 0x32f   :  { %3659 = vmatpush3.bf16.msra.mxu0 %v4264_v61 }
 0x330   :  { %2871 = vmatmul.mubr.f32.vlgmr.msra.gmra.mrb[6].mxu1 %v511_v49  ;;  %3684 = vmatprep.subr.bf16.mxu0 %v4145_v0 }
 0x331   :  { %3662 = vmatpush3.bf16.msra.mxu1 %v4231_v39  ;;  %2940 = vmatprep.mubr.msk.f32.mxu1 %vm4146_vm0, %v4147_v1 }
 0x332   :  { %3663 = vmatprep.subr.bf16.mxu1 %v4145_v0 }
 0x335   :  { %3665 = vmatpush3.bf16.msra.mxu1 %v4238_v45 }
 0x336   :  { %3666 = vmatprep.subr.bf16.mxu1 %v4145_v0 }
 0x339   :  { %3668 = vmatpush3.bf16.msra.mxu1 %v4246_v51 }
 0x33a   :  { %3669 = vmatprep.subr.bf16.mxu1 %v4145_v0 }
 0x33d   :  { %3671 = vmatpush3.bf16.msra.mxu1 %v4293_v12 }
 0x33e   :  { %3672 = vmatprep.subr.bf16.mxu1 %v4145_v0 }
 0x341   :  { %3674 = vmatpush3.bf16.msra.mxu1 %v4297_v17 }
 0x342   :  { %3675 = vmatprep.subr.bf16.mxu1 %v4145_v0 }
 0x345   :  { %3677 = vmatpush3.bf16.msra.mxu1 %v4301_v23 }
 0x346   :  { %3678 = vmatprep.subr.bf16.mxu1 %v4145_v0 }
 0x349   :  { %3680 = vmatpush3.bf16.msra.mxu1 %v4304_v29 }
 0x34a   :  { %3681 = vmatprep.subr.bf16.mxu1 %v4145_v0 }
 0x34d   :  { %3683 = vmatpush3.bf16.msra.mxu1 %v4310_v35 }
 0x34e   :  { %3708 = vmatprep.subr.bf16.mxu1 %v4145_v0 }
 0x3e3   :  { %v578_v41 = vpop.f32.mrb[4].mxu1 }
 0x3e4   :  { %v2802_v53 = vpop.f32.mrb[5].mxu1  ;;  %v648_v54 = vpop.f32.mrb[6].mxu0 }
 0x3e5   :  { %v649_v56 = vadd.f32 %v648_v54, %v578_v41  ;;  %v2837_v57 = vpop.f32.mrb[7].mxu0 }
 0x3e7   :  { %v652_v59 = vadd.f32 %v4355_v50, %v649_v56 }
 0x3e9   :  { %4065 = vtanh.f32 %v652_v59 }
 0x3f3   :  { %v4066_v60 = vpop.eup %4065 }
 0x3f4   :  { %658 = vrot.lane.b32.xlu0 %v4066_v60, %s4150_s27  ;;  %v654_v62 = vmul.f32 0.5, %v4066_v60 }
 0x3f6   :  { %v655_v63 = vadd.f32 0.5, %v654_v62 }
 0x3f8   :  { %656 = vrot.lane.b32.xlu1 %v655_v63, %s4149_s26 }
 0x3fc   :  { %660 = vrot.lane.b32.xlu1 %v655_v63, %s4148_s0 }
 0x403   :  { %v733_v3 = vpop.f32.mrb[6].mxu1 }
 0x404   :  { %v738_v6 = vrot.slane %v733_v3, 4  ;;  %v2872_v8 = vpop.f32.mrb[7].mxu1 }
 0x406   :  { %v740_v9 = vadd.f32 %v738_v6, %v4290_v4 }
 0x408   :  { %4067 = vtanh.f32 %v740_v9 }
 0x412   :  { %v4068_v10 = vpop.eup %4067 }
 0x413   :  { %v750_v11 = vrot.slane %v4068_v10, 4  ;;  %v742_v14 = vmul.f32 0.5, %v4068_v10 }
 0x415   :  { %752 = vrot.lane.b32.xlu0 %v750_v11, %s4150_s27  ;;  %v743_v15 = vadd.f32 0.5, %v742_v14 }
 0x417   :  { %v745_v18 = vrot.slane %v743_v15, 4 }
 0x419   :  { %754 = vrot.lane.b32.xlu0 %v745_v18, %s4148_s0  ;;  %747 = vrot.lane.b32.xlu1 %v745_v18, %s4149_s26 }
 0x466   :  { %v659_v20 = vpop.permute.xlu0 %658 }
 0x467   :  { %v663_v24 = vmul.f32 %v659_v20, %v655_v63 }
 0x46a   :  { %v657_v21 = vpop.permute.xlu1 %656 }
 0x46b   :  { %v662_v26 = vmul.f32 %v657_v21, %v4366_v37 }
 0x46d   :  { %v4435_v27 = vadd.f32 %v663_v24, %v662_v26 }
 0x46e   :  { %v661_v31 = vpop.permute.xlu1 %660 }
 0x46f   :  { %4069 = vtanh.f32 %v4435_v27 }
 0x479   :  { %v4070_v30 = vpop.eup %4069 }
 0x47a   :  { %v666_v33 = vmul.f32 %v4070_v30, %v661_v31 }
 0x47c   :  { %2906 = vmatmul.mubr.f32.vlgmr.msra.gmra.mrb[8].mxu0 %v666_v33 }
 0x47d   :  { %3686 = vmatpush3.bf16.msra.mxu0 %v4181_v5  ;;  %2975 = vmatprep.mubr.msk.f32.mxu0 %vm4146_vm0, %v4147_v1 }
 0x47e   :  { %3687 = vmatprep.subr.bf16.mxu0 %v4145_v0 }
 0x481   :  { %3689 = vmatpush3.bf16.msra.mxu0 %v4184_v7 }
 0x482   :  { %3690 = vmatprep.subr.bf16.mxu0 %v4145_v0 }
 0x485   :  { %3692 = vmatpush3.bf16.msra.mxu0 %v4194_v13 }
 0x486   :  { %3693 = vmatprep.subr.bf16.mxu0 %v4145_v0 }
 0x487   :  { %v753_v36 = vpop.permute.xlu0 %752 }
 0x488   :  { %v758_v37 = vrot.slane %v753_v36, 4 }
 0x489   :  { %3695 = vmatpush3.bf16.msra.mxu0 %v4201_v16 }
 0x48a   :  { %v760_v40 = vmul.f32 %v758_v37, %v743_v15  ;;  %3696 = vmatprep.subr.bf16.mxu0 %v4145_v0 }
 0x48b   :  { %v748_v43 = vpop.permute.xlu1 %747 }
 0x48c   :  { %v762_v44 = vrot.slane %v760_v40, 4  ;;  %v756_v46 = vmul.f32 %v748_v43, %v4368_v38  ;;  %v755_v38 = vpop.permute.xlu0 %754 }
 0x48d   :  { %3698 = vmatpush3.bf16.msra.mxu0 %v4205_v19 }
 0x48e   :  { %v4450_v47 = vadd.f32 %v762_v44, %v756_v46  ;;  %3699 = vmatprep.subr.bf16.mxu0 %v4145_v0 }
 0x490   :  { %4071 = vtanh.f32 %v4450_v47 }
 0x491   :  { %3701 = vmatpush3.bf16.msra.mxu0 %v4209_v22 }
 0x492   :  { %3702 = vmatprep.subr.bf16.mxu0 %v4145_v0 }
 0x495   :  { %3704 = vmatpush3.bf16.msra.mxu0 %v4213_v25 }
 0x496   :  { %3705 = vmatprep.subr.bf16.mxu0 %v4145_v0 }
 0x499   :  { %3707 = vmatpush3.bf16.msra.mxu0 %v4217_v28 }
 0x49a   :  { %v4072_v49 = vpop.eup %4071  ;;  %3732 = vmatprep.subr.bf16.mxu0 %v4145_v0 }
 0x49b   :  { %v766_v41 = vmul.f32 %v4072_v49, %v755_v38 }
 0x49d   :  { %2941 = vmatmul.mubr.f32.vlgmr.msra.gmra.mrb[8].mxu1 %v766_v41  ;;  %2976 = vmatmul.mubr.f32.vlgmr.msra.gmra.mrb[10].mxu0 %v766_v41 }
 0x49e   :  { %3710 = vmatpush3.bf16.msra.mxu1 %v4225_v32  ;;  %3734 = vmatpush3.bf16.msra.mxu0 %v4231_v39 }
 0x49f   :  { %3711 = vmatprep.subr.bf16.mxu1 %v4145_v0  ;;  %3735 = vmatprep.subr.bf16.mxu0 %v4145_v0 }
 0x4a0   :  { %3010 = vmatprep.mubr.msk.f32.mxu1 %vm4146_vm0, %v4147_v1  ;;  %3045 = vmatprep.mubr.msk.f32.mxu0 %vm4146_vm0, %v4147_v1 }
 0x4a2   :  { %3713 = vmatpush3.bf16.msra.mxu1 %v4228_v34  ;;  %3737 = vmatpush3.bf16.msra.mxu0 %v4238_v45 }
 0x4a3   :  { %3714 = vmatprep.subr.bf16.mxu1 %v4145_v0  ;;  %3738 = vmatprep.subr.bf16.mxu0 %v4145_v0 }
 0x4a6   :  { %3716 = vmatpush3.bf16.msra.mxu1 %v4234_v42  ;;  %3740 = vmatpush3.bf16.msra.mxu0 %v4246_v51 }
 0x4a7   :  { %3717 = vmatprep.subr.bf16.mxu1 %v4145_v0  ;;  %3741 = vmatprep.subr.bf16.mxu0 %v4145_v0 }
 0x4aa   :  { %3719 = vmatpush3.bf16.msra.mxu1 %v4242_v48  ;;  %3743 = vmatpush3.bf16.msra.mxu0 %v4293_v12 }
 0x4ab   :  { %3720 = vmatprep.subr.bf16.mxu1 %v4145_v0  ;;  %3744 = vmatprep.subr.bf16.mxu0 %v4145_v0 }
 0x4ae   :  { %3722 = vmatpush3.bf16.msra.mxu1 %v4250_v52  ;;  %3746 = vmatpush3.bf16.msra.mxu0 %v4297_v17 }
 0x4af   :  { %3723 = vmatprep.subr.bf16.mxu1 %v4145_v0  ;;  %3747 = vmatprep.subr.bf16.mxu0 %v4145_v0 }
 0x4b2   :  { %3725 = vmatpush3.bf16.msra.mxu1 %v4256_v55  ;;  %3749 = vmatpush3.bf16.msra.mxu0 %v4301_v23 }
 0x4b3   :  { %3726 = vmatprep.subr.bf16.mxu1 %v4145_v0  ;;  %3750 = vmatprep.subr.bf16.mxu0 %v4145_v0 }
 0x4b6   :  { %3728 = vmatpush3.bf16.msra.mxu1 %v4260_v58  ;;  %3752 = vmatpush3.bf16.msra.mxu0 %v4304_v29 }
 0x4b7   :  { %3729 = vmatprep.subr.bf16.mxu1 %v4145_v0  ;;  %3753 = vmatprep.subr.bf16.mxu0 %v4145_v0 }
 0x4ba   :  { %3731 = vmatpush3.bf16.msra.mxu1 %v4264_v61  ;;  %3755 = vmatpush3.bf16.msra.mxu0 %v4310_v35 }
 0x4bb   :  { %3756 = vmatprep.subr.bf16.mxu1 %v4145_v0  ;;  %3780 = vmatprep.subr.bf16.mxu0 %v4145_v0 }
 0x54f   :  { %v833_v53 = vpop.f32.mrb[8].mxu0 }
 0x550   :  { %v2907_v54 = vpop.f32.mrb[9].mxu0 }
 0x570   :  { %v903_v56 = vpop.f32.mrb[8].mxu1  ;;  %v988_v57 = vpop.f32.mrb[10].mxu0 }
 0x571   :  { %v904_v59 = vadd.f32 %v903_v56, %v833_v53  ;;  %v993_v60 = vrot.slane %v988_v57, 2  ;;  %v2942_v62 = vpop.f32.mrb[9].mxu1  ;;  %v2977_v63 = vpop.f32.mrb[11].mxu0 }
 0x573   :  { %v907_v3 = vadd.f32 %v4355_v50, %v904_v59  ;;  %v995_v6 = vadd.f32 %v993_v60, %v4290_v4 }
 0x575   :  { %4073 = vtanh.f32 %v907_v3 }
 0x576   :  { %4075 = vtanh.f32 %v995_v6 }
 0x57f   :  { %v4074_v8 = vpop.eup %4073 }
 0x580   :  { %v4076_v9 = vpop.eup %4075  ;;  %v909_v10 = vmul.f32 0.5, %v4074_v8 }
 0x581   :  { %v1005_v11 = vrot.slane %v4076_v9, 6  ;;  %v997_v14 = vmul.f32 0.5, %v4076_v9 }
 0x582   :  { %v910_v15 = vadd.f32 0.5, %v909_v10 }
 0x583   :  { %1007 = vrot.lane.b32.xlu1 %v1005_v11, %s4150_s27  ;;  %v998_v18 = vadd.f32 0.5, %v997_v14 }
 0x584   :  { %911 = vrot.lane.b32.xlu0 %v910_v15, %s4149_s26 }
 0x585   :  { %v1000_v20 = vrot.slane %v998_v18, 6 }
 0x587   :  { %913 = vrot.lane.b32.xlu1 %v4074_v8, %s4150_s27 }
 0x588   :  { %1002 = vrot.lane.b32.xlu0 %v1000_v20, %s4149_s26 }
 0x58b   :  { %915 = vrot.lane.b32.xlu1 %v910_v15, %s4148_s0 }
 0x58c   :  { %1009 = vrot.lane.b32.xlu0 %v1000_v20, %s4148_s0 }
 0x5f5   :  { %v1008_v4 = vpop.permute.xlu1 %1007 }
 0x5f6   :  { %v1013_v21 = vrot.slane %v1008_v4, 2  ;;  %v912_v24 = vpop.permute.xlu0 %911 }
 0x5f7   :  { %v917_v31 = vmul.f32 %v912_v24, %v4435_v27 }
 0x5f8   :  { %v1015_v26 = vmul.f32 %v1013_v21, %v998_v18 }
 0x5f9   :  { %v914_v30 = vpop.permute.xlu1 %913 }
 0x5fa   :  { %v918_v33 = vmul.f32 %v914_v30, %v910_v15  ;;  %v1003_v36 = vpop.permute.xlu0 %1002  ;;  %v1017_v37 = vrot.slane %v1015_v26, 6 }
 0x5fb   :  { %v1011_v40 = vmul.f32 %v1003_v36, %v4450_v47 }
 0x5fc   :  { %v4506_v43 = vadd.f32 %v918_v33, %v917_v31 }
 0x5fd   :  { %v4508_v44 = vadd.f32 %v1017_v37, %v1011_v40  ;;  %v916_v49 = vpop.permute.xlu1 %915 }
 0x5fe   :  { %4077 = vtanh.f32 %v4506_v43  ;;  %v1010_v53 = vpop.permute.xlu0 %1009 }
 0x5ff   :  { %4079 = vtanh.f32 %v4508_v44 }
 0x608   :  { %v4078_v46 = vpop.eup %4077 }
 0x609   :  { %v4080_v38 = vpop.eup %4079  ;;  %v921_v41 = vmul.f32 %v4078_v46, %v916_v49 }
 0x60a   :  { %v1021_v54 = vmul.f32 %v4080_v38, %v1010_v53 }
 0x60b   :  { %3011 = vmatmul.mubr.f32.vlgmr.msra.gmra.mrb[10].mxu1 %v921_v41 }
 0x60c   :  { %3758 = vmatpush3.bf16.msra.mxu1 %v4181_v5  ;;  %3046 = vmatmul.mubr.f32.vlgmr.msra.gmra.mrb[12].mxu0 %v1021_v54 }
 0x60d   :  { %3759 = vmatprep.subr.bf16.mxu1 %v4145_v0  ;;  %3080 = vmatprep.mubr.msk.f32.mxu1 %vm4146_vm0, %v4147_v1 }
 0x60e   :  { %3782 = vmatpush3.bf16.msra.mxu0 %v4225_v32  ;;  %3115 = vmatprep.mubr.msk.f32.mxu0 %vm4146_vm0, %v4147_v1 }
 0x60f   :  { %3783 = vmatprep.subr.bf16.mxu0 %v4145_v0 }
 0x610   :  { %3761 = vmatpush3.bf16.msra.mxu1 %v4184_v7 }
 0x611   :  { %3762 = vmatprep.subr.bf16.mxu1 %v4145_v0 }
 0x612   :  { %3785 = vmatpush3.bf16.msra.mxu0 %v4228_v34 }
 0x613   :  { %3786 = vmatprep.subr.bf16.mxu0 %v4145_v0 }
 0x614   :  { %3764 = vmatpush3.bf16.msra.mxu1 %v4194_v13 }
 0x615   :  { %3765 = vmatprep.subr.bf16.mxu1 %v4145_v0 }
 0x616   :  { %3788 = vmatpush3.bf16.msra.mxu0 %v4234_v42 }
 0x617   :  { %3789 = vmatprep.subr.bf16.mxu0 %v4145_v0 }
 0x618   :  { %3767 = vmatpush3.bf16.msra.mxu1 %v4201_v16 }
 0x619   :  { %3768 = vmatprep.subr.bf16.mxu1 %v4145_v0 }
 0x61a   :  { %3791 = vmatpush3.bf16.msra.mxu0 %v4242_v48 }
 0x61b   :  { %3792 = vmatprep.subr.bf16.mxu0 %v4145_v0 }
 0x61c   :  { %3770 = vmatpush3.bf16.msra.mxu1 %v4205_v19 }
 0x61d   :  { %3771 = vmatprep.subr.bf16.mxu1 %v4145_v0 }
 0x61e   :  { %3794 = vmatpush3.bf16.msra.mxu0 %v4250_v52 }
 0x61f   :  { %3795 = vmatprep.subr.bf16.mxu0 %v4145_v0 }
 0x620   :  { %3773 = vmatpush3.bf16.msra.mxu1 %v4209_v22 }
 0x621   :  { %3774 = vmatprep.subr.bf16.mxu1 %v4145_v0 }
 0x622   :  { %3797 = vmatpush3.bf16.msra.mxu0 %v4256_v55 }
 0x623   :  { %3798 = vmatprep.subr.bf16.mxu0 %v4145_v0 }
 0x624   :  { %3776 = vmatpush3.bf16.msra.mxu1 %v4213_v25 }
 0x625   :  { %3777 = vmatprep.subr.bf16.mxu1 %v4145_v0 }
 0x626   :  { %3800 = vmatpush3.bf16.msra.mxu0 %v4260_v58 }
 0x627   :  { %3801 = vmatprep.subr.bf16.mxu0 %v4145_v0 }
 0x628   :  { %3779 = vmatpush3.bf16.msra.mxu1 %v4217_v28 }
 0x629   :  { %3804 = vmatprep.subr.bf16.mxu1 %v4145_v0 }
 0x62a   :  { %3803 = vmatpush3.bf16.msra.mxu0 %v4264_v61 }
 0x62b   :  { %3081 = vmatmul.mubr.f32.vlgmr.msra.gmra.mrb[12].mxu1 %v1021_v54  ;;  %3828 = vmatprep.subr.bf16.mxu0 %v4145_v0 }
 0x62c   :  { %3806 = vmatpush3.bf16.msra.mxu1 %v4231_v39  ;;  %3150 = vmatprep.mubr.msk.f32.mxu1 %vm4146_vm0, %v4147_v1 }
 0x62d   :  { %3807 = vmatprep.subr.bf16.mxu1 %v4145_v0 }
 0x630   :  { %3809 = vmatpush3.bf16.msra.mxu1 %v4238_v45 }
 0x631   :  { %3810 = vmatprep.subr.bf16.mxu1 %v4145_v0 }
 0x634   :  { %3812 = vmatpush3.bf16.msra.mxu1 %v4246_v51 }
 0x635   :  { %3813 = vmatprep.subr.bf16.mxu1 %v4145_v0 }
 0x638   :  { %3815 = vmatpush3.bf16.msra.mxu1 %v4293_v12 }
 0x639   :  { %3816 = vmatprep.subr.bf16.mxu1 %v4145_v0 }
 0x63c   :  { %3818 = vmatpush3.bf16.msra.mxu1 %v4297_v17 }
 0x63d   :  { %3819 = vmatprep.subr.bf16.mxu1 %v4145_v0 }
 0x640   :  { %3821 = vmatpush3.bf16.msra.mxu1 %v4301_v23 }
 0x641   :  { %3822 = vmatprep.subr.bf16.mxu1 %v4145_v0 }
 0x644   :  { %3824 = vmatpush3.bf16.msra.mxu1 %v4304_v29 }
 0x645   :  { %3825 = vmatprep.subr.bf16.mxu1 %v4145_v0 }
 0x648   :  { %3827 = vmatpush3.bf16.msra.mxu1 %v4310_v35 }
 0x649   :  { %3852 = vmatprep.subr.bf16.mxu1 %v4145_v0 }
 0x6de   :  { %v1088_v27 = vpop.f32.mrb[10].mxu1 }
 0x6df   :  { %v3012_v47 = vpop.f32.mrb[11].mxu1  ;;  %v1158_v56 = vpop.f32.mrb[12].mxu0 }
 0x6e0   :  { %v1159_v57 = vadd.f32 %v1158_v56, %v1088_v27  ;;  %v3047_v59 = vpop.f32.mrb[13].mxu0 }
 0x6e2   :  { %v1162_v60 = vadd.f32 %v4355_v50, %v1159_v57 }
 0x6e4   :  { %4081 = vtanh.f32 %v1162_v60 }
 0x6ee   :  { %v4082_v62 = vpop.eup %4081 }
 0x6ef   :  { %1168 = vrot.lane.b32.xlu0 %v4082_v62, %s4150_s27  ;;  %v1164_v63 = vmul.f32 0.5, %v4082_v62 }
 0x6f1   :  { %v1165_v3 = vadd.f32 0.5, %v1164_v63 }
 0x6f3   :  { %1166 = vrot.lane.b32.xlu1 %v1165_v3, %s4149_s26 }
 0x6f7   :  { %1170 = vrot.lane.b32.xlu1 %v1165_v3, %s4148_s0 }
 0x6fe   :  { %v1243_v6 = vpop.f32.mrb[12].mxu1 }
 0x6ff   :  { %v1247_v8 = vadd.f32 %v1243_v6, %v4288_v2  ;;  %v3082_v9 = vpop.f32.mrb[13].mxu1 }
 0x701   :  { %4083 = vtanh.f32 %v1247_v8 }
 0x70b   :  { %v4084_v10 = vpop.eup %4083 }
 0x70c   :  { %1253 = vrot.lane.b32.xlu1 %v4084_v10, %s4150_s27  ;;  %v1249_v11 = vmul.f32 0.5, %v4084_v10 }
 0x70e   :  { %v1250_v14 = vadd.f32 0.5, %v1249_v11 }
 0x710   :  { %1251 = vrot.lane.b32.xlu0 %v1250_v14, %s4149_s26 }
 0x714   :  { %1255 = vrot.lane.b32.xlu0 %v1250_v14, %s4148_s0 }
 0x761   :  { %v1169_v15 = vpop.permute.xlu0 %1168 }
 0x762   :  { %v1173_v20 = vmul.f32 %v1169_v15, %v1165_v3 }
 0x765   :  { %v1167_v18 = vpop.permute.xlu1 %1166 }
 0x766   :  { %v1172_v4 = vmul.f32 %v1167_v18, %v4506_v43 }
 0x768   :  { %v4575_v21 = vadd.f32 %v1173_v20, %v1172_v4 }
 0x769   :  { %v1171_v26 = vpop.permute.xlu1 %1170 }
 0x76a   :  { %4085 = vtanh.f32 %v4575_v21 }
 0x774   :  { %v4086_v24 = vpop.eup %4085 }
 0x775   :  { %v1176_v30 = vmul.f32 %v4086_v24, %v1171_v26 }
 0x777   :  { %3116 = vmatmul.mubr.f32.vlgmr.msra.gmra.mrb[14].mxu0 %v1176_v30 }
 0x778   :  { %3830 = vmatpush3.bf16.msra.mxu0 %v4181_v5  ;;  %3185 = vmatprep.mubr.msk.f32.mxu0 %vm4146_vm0, %v4147_v1 }
 0x779   :  { %3831 = vmatprep.subr.bf16.mxu0 %v4145_v0 }
 0x77c   :  { %3833 = vmatpush3.bf16.msra.mxu0 %v4184_v7 }
 0x77d   :  { %3834 = vmatprep.subr.bf16.mxu0 %v4145_v0 }
 0x77e   :  { %v1254_v31 = vpop.permute.xlu1 %1253 }
 0x77f   :  { %v1258_v36 = vmul.f32 %v1254_v31, %v1250_v14 }
 0x780   :  { %3836 = vmatpush3.bf16.msra.mxu0 %v4194_v13 }
 0x781   :  { %3837 = vmatprep.subr.bf16.mxu0 %v4145_v0 }
 0x782   :  { %v1252_v33 = vpop.permute.xlu0 %1251 }
 0x783   :  { %v1257_v37 = vmul.f32 %v1252_v33, %v4508_v44 }
 0x784   :  { %3839 = vmatpush3.bf16.msra.mxu0 %v4201_v16 }
 0x785   :  { %v4588_v40 = vadd.f32 %v1258_v36, %v1257_v37  ;;  %3840 = vmatprep.subr.bf16.mxu0 %v4145_v0 }
 0x786   :  { %v1256_v44 = vpop.permute.xlu0 %1255 }
 0x787   :  { %4087 = vtanh.f32 %v4588_v40 }
 0x788   :  { %3842 = vmatpush3.bf16.msra.mxu0 %v4205_v19 }
 0x789   :  { %3843 = vmatprep.subr.bf16.mxu0 %v4145_v0 }
 0x78c   :  { %3845 = vmatpush3.bf16.msra.mxu0 %v4209_v22 }
 0x78d   :  { %3846 = vmatprep.subr.bf16.mxu0 %v4145_v0 }
 0x790   :  { %3848 = vmatpush3.bf16.msra.mxu0 %v4213_v25 }
 0x791   :  { %v4088_v43 = vpop.eup %4087  ;;  %3849 = vmatprep.subr.bf16.mxu0 %v4145_v0 }
 0x792   :  { %v1261_v46 = vmul.f32 %v4088_v43, %v1256_v44 }
 0x794   :  { %3151 = vmatmul.mubr.f32.vlgmr.msra.gmra.mrb[14].mxu1 %v1261_v46  ;;  %3851 = vmatpush3.bf16.msra.mxu0 %v4217_v28 }
 0x795   :  { %3854 = vmatpush3.bf16.msra.mxu1 %v4225_v32  ;;  %3876 = vmatprep.subr.bf16.mxu0 %v4145_v0 }
 0x796   :  { %3855 = vmatprep.subr.bf16.mxu1 %v4145_v0  ;;  %3220 = vmatprep.mubr.msk.f32.mxu1 %vm4146_vm0, %v4147_v1 }
 0x797   :  { %3186 = vmatmul.mubr.f32.vlgmr.msra.gmra.mrb[16].mxu0 %v1261_v46 }
 0x798   :  { %3878 = vmatpush3.bf16.msra.mxu0 %v4231_v39  ;;  %3255 = vmatprep.mubr.msk.f32.mxu0 %vm4146_vm0, %v4147_v1 }
 0x799   :  { %3857 = vmatpush3.bf16.msra.mxu1 %v4228_v34  ;;  %3879 = vmatprep.subr.bf16.mxu0 %v4145_v0 }
 0x79a   :  { %3858 = vmatprep.subr.bf16.mxu1 %v4145_v0 }
 0x79c   :  { %3881 = vmatpush3.bf16.msra.mxu0 %v4238_v45 }
 0x79d   :  { %3860 = vmatpush3.bf16.msra.mxu1 %v4234_v42  ;;  %3882 = vmatprep.subr.bf16.mxu0 %v4145_v0 }
 0x79e   :  { %3861 = vmatprep.subr.bf16.mxu1 %v4145_v0 }
 0x7a0   :  { %3884 = vmatpush3.bf16.msra.mxu0 %v4246_v51 }
 0x7a1   :  { %3863 = vmatpush3.bf16.msra.mxu1 %v4242_v48  ;;  %3885 = vmatprep.subr.bf16.mxu0 %v4145_v0 }
 0x7a2   :  { %3864 = vmatprep.subr.bf16.mxu1 %v4145_v0 }
 0x7a4   :  { %3887 = vmatpush3.bf16.msra.mxu0 %v4293_v12 }
 0x7a5   :  { %3866 = vmatpush3.bf16.msra.mxu1 %v4250_v52  ;;  %3888 = vmatprep.subr.bf16.mxu0 %v4145_v0 }
 0x7a6   :  { %3867 = vmatprep.subr.bf16.mxu1 %v4145_v0 }
 0x7a8   :  { %3890 = vmatpush3.bf16.msra.mxu0 %v4297_v17 }
 0x7a9   :  { %3869 = vmatpush3.bf16.msra.mxu1 %v4256_v55  ;;  %3891 = vmatprep.subr.bf16.mxu0 %v4145_v0 }
 0x7aa   :  { %3870 = vmatprep.subr.bf16.mxu1 %v4145_v0 }
 0x7ac   :  { %3893 = vmatpush3.bf16.msra.mxu0 %v4301_v23 }
 0x7ad   :  { %3872 = vmatpush3.bf16.msra.mxu1 %v4260_v58  ;;  %3894 = vmatprep.subr.bf16.mxu0 %v4145_v0 }
 0x7ae   :  { %3873 = vmatprep.subr.bf16.mxu1 %v4145_v0 }
 0x7b0   :  { %3896 = vmatpush3.bf16.msra.mxu0 %v4304_v29 }
 0x7b1   :  { %3875 = vmatpush3.bf16.msra.mxu1 %v4264_v61  ;;  %3897 = vmatprep.subr.bf16.mxu0 %v4145_v0 }
 0x7b2   :  { %3900 = vmatprep.subr.bf16.mxu1 %v4145_v0 }
 0x7b4   :  { %3899 = vmatpush3.bf16.msra.mxu0 %v4310_v35 }
 0x7b5   :  { %3924 = vmatprep.subr.bf16.mxu0 %v4145_v0 }
 0x84a   :  { %v1328_v49 = vpop.f32.mrb[14].mxu0 }
 0x84b   :  { %v3117_v38 = vpop.f32.mrb[15].mxu0 }
 0x867   :  { %v1398_v41 = vpop.f32.mrb[14].mxu1 }
 0x868   :  { %v1399_v53 = vadd.f32 %v1398_v41, %v1328_v49  ;;  %v3152_v54 = vpop.f32.mrb[15].mxu1 }
 0x86a   :  { %v1402_v27 = vadd.f32 %v4355_v50, %v1399_v53  ;;  %v1483_v47 = vpop.f32.mrb[16].mxu0 }
 0x86b   :  { %v1488_v56 = vrot.slane %v1483_v47, 6  ;;  %v3187_v57 = vpop.f32.mrb[17].mxu0 }
 0x86c   :  { %4089 = vtanh.f32 %v1402_v27 }
 0x86d   :  { %v1490_v59 = vadd.f32 %v1488_v56, %v4288_v2 }
 0x86f   :  { %4091 = vtanh.f32 %v1490_v59 }
 0x876   :  { %v4090_v60 = vpop.eup %4089 }
 0x877   :  { %v1404_v62 = vmul.f32 0.5, %v4090_v60 }
 0x879   :  { %v4092_v63 = vpop.eup %4091  ;;  %v1405_v3 = vadd.f32 0.5, %v1404_v62 }
 0x87a   :  { %v1500_v6 = vrot.slane %v4092_v63, 2  ;;  %v1492_v8 = vmul.f32 0.5, %v4092_v63 }
 0x87b   :  { %1406 = vrot.lane.b32.xlu0 %v1405_v3, %s4149_s26 }
 0x87c   :  { %1502 = vrot.lane.b32.xlu1 %v1500_v6, %s4150_s27  ;;  %v1493_v9 = vadd.f32 0.5, %v1492_v8 }
 0x87e   :  { %v1495_v10 = vrot.slane %v1493_v9, 2 }
 0x880   :  { %1408 = vrot.lane.b32.xlu1 %v4090_v60, %s4150_s27  ;;  %1497 = vrot.lane.b32.xlu0 %v1495_v10, %s4149_s26 }
 0x884   :  { %1410 = vrot.lane.b32.xlu1 %v1405_v3, %s4148_s0  ;;  %1504 = vrot.lane.b32.xlu0 %v1495_v10, %s4148_s0 }
 0x8ed   :  { %v1407_v11 = vpop.permute.xlu0 %1406 }
 0x8ee   :  { %v1503_v14 = vpop.permute.xlu1 %1502  ;;  %v1412_v24 = vmul.f32 %v1407_v11, %v4575_v21 }
 0x8ef   :  { %v1508_v15 = vrot.slane %v1503_v14, 6 }
 0x8f1   :  { %v1510_v18 = vmul.f32 %v1508_v15, %v1493_v9 }
 0x8f2   :  { %v1409_v20 = vpop.permute.xlu1 %1408  ;;  %v1498_v4 = vpop.permute.xlu0 %1497 }
 0x8f3   :  { %v1512_v26 = vrot.slane %v1510_v18, 2  ;;  %v1413_v30 = vmul.f32 %v1409_v20, %v1405_v3  ;;  %v1506_v31 = vmul.f32 %v1498_v4, %v4588_v40 }
 0x8f5   :  { %v4646_v33 = vadd.f32 %v1413_v30, %v1412_v24  ;;  %v4648_v36 = vadd.f32 %v1512_v26, %v1506_v31 }
 0x8f6   :  { %v1411_v43 = vpop.permute.xlu1 %1410  ;;  %v1505_v49 = vpop.permute.xlu0 %1504 }
 0x8f7   :  { %4093 = vtanh.f32 %v4646_v33 }
 0x8f8   :  { %4095 = vtanh.f32 %v4648_v36 }
 0x901   :  { %v4094_v37 = vpop.eup %4093 }
 0x902   :  { %v4096_v44 = vpop.eup %4095  ;;  %v1416_v46 = vmul.f32 %v4094_v37, %v1411_v43 }
 0x903   :  { %v1516_v38 = vmul.f32 %v4096_v44, %v1505_v49 }
 0x904   :  { %3221 = vmatmul.mubr.f32.vlgmr.msra.gmra.mrb[16].mxu1 %v1416_v46 }
 0x905   :  { %3256 = vmatmul.mubr.f32.vlgmr.msra.gmra.mrb[18].mxu0 %v1516_v38  ;;  %3902 = vmatpush3.bf16.msra.mxu1 %v4181_v5 }
 0x906   :  { %3903 = vmatprep.subr.bf16.mxu1 %v4145_v0  ;;  %3290 = vmatprep.mubr.msk.f32.mxu1 %vm4146_vm0, %v4147_v1 }
 0x907   :  { %3926 = vmatpush3.bf16.msra.mxu0 %v4225_v32  ;;  %3325 = vmatprep.mubr.msk.f32.mxu0 %vm4146_vm0, %v4147_v1 }
 0x908   :  { %3927 = vmatprep.subr.bf16.mxu0 %v4145_v0 }
 0x909   :  { %3905 = vmatpush3.bf16.msra.mxu1 %v4184_v7 }
 0x90a   :  { %3906 = vmatprep.subr.bf16.mxu1 %v4145_v0 }
 0x90b   :  { %3929 = vmatpush3.bf16.msra.mxu0 %v4228_v34 }
 0x90c   :  { %3930 = vmatprep.subr.bf16.mxu0 %v4145_v0 }
 0x90d   :  { %3908 = vmatpush3.bf16.msra.mxu1 %v4194_v13 }
 0x90e   :  { %3909 = vmatprep.subr.bf16.mxu1 %v4145_v0 }
 0x90f   :  { %3932 = vmatpush3.bf16.msra.mxu0 %v4234_v42 }
 0x910   :  { %3933 = vmatprep.subr.bf16.mxu0 %v4145_v0 }
 0x911   :  { %3911 = vmatpush3.bf16.msra.mxu1 %v4201_v16 }
 0x912   :  { %3912 = vmatprep.subr.bf16.mxu1 %v4145_v0 }
 0x913   :  { %3935 = vmatpush3.bf16.msra.mxu0 %v4242_v48 }
 0x914   :  { %3936 = vmatprep.subr.bf16.mxu0 %v4145_v0 }
 0x915   :  { %3914 = vmatpush3.bf16.msra.mxu1 %v4205_v19 }
 0x916   :  { %3915 = vmatprep.subr.bf16.mxu1 %v4145_v0 }
 0x917   :  { %3938 = vmatpush3.bf16.msra.mxu0 %v4250_v52 }
 0x918   :  { %3939 = vmatprep.subr.bf16.mxu0 %v4145_v0 }
 0x919   :  { %3917 = vmatpush3.bf16.msra.mxu1 %v4209_v22 }
 0x91a   :  { %3918 = vmatprep.subr.bf16.mxu1 %v4145_v0 }
 0x91b   :  { %3941 = vmatpush3.bf16.msra.mxu0 %v4256_v55 }
 0x91c   :  { %3942 = vmatprep.subr.bf16.mxu0 %v4145_v0 }
 0x91d   :  { %3920 = vmatpush3.bf16.msra.mxu1 %v4213_v25 }
 0x91e   :  { %3921 = vmatprep.subr.bf16.mxu1 %v4145_v0 }
 0x91f   :  { %3944 = vmatpush3.bf16.msra.mxu0 %v4260_v58 }
 0x920   :  { %3945 = vmatprep.subr.bf16.mxu0 %v4145_v0 }
 0x921   :  { %3923 = vmatpush3.bf16.msra.mxu1 %v4217_v28 }
 0x922   :  { %3948 = vmatprep.subr.bf16.mxu1 %v4145_v0 }
 0x923   :  { %3947 = vmatpush3.bf16.msra.mxu0 %v4264_v61 }
 0x924   :  { %3291 = vmatmul.mubr.f32.vlgmr.msra.gmra.mrb[18].mxu1 %v1516_v38  ;;  %3972 = vmatprep.subr.bf16.mxu0 %v4145_v0 }
 0x925   :  { %3950 = vmatpush3.bf16.msra.mxu1 %v4231_v39  ;;  %3360 = vmatprep.mubr.msk.f32.mxu1 %vm4146_vm0, %v4147_v1 }
 0x926   :  { %3951 = vmatprep.subr.bf16.mxu1 %v4145_v0 }
 0x929   :  { %3953 = vmatpush3.bf16.msra.mxu1 %v4238_v45 }
 0x92a   :  { %3954 = vmatprep.subr.bf16.mxu1 %v4145_v0 }
 0x92d   :  { %3956 = vmatpush3.bf16.msra.mxu1 %v4246_v51 }
 0x92e   :  { %3957 = vmatprep.subr.bf16.mxu1 %v4145_v0 }
 0x931   :  { %3959 = vmatpush3.bf16.msra.mxu1 %v4293_v12 }
 0x932   :  { %3960 = vmatprep.subr.bf16.mxu1 %v4145_v0 }
 0x935   :  { %3962 = vmatpush3.bf16.msra.mxu1 %v4297_v17 }
 0x936   :  { %3963 = vmatprep.subr.bf16.mxu1 %v4145_v0 }
 0x939   :  { %3965 = vmatpush3.bf16.msra.mxu1 %v4301_v23 }
 0x93a   :  { %3966 = vmatprep.subr.bf16.mxu1 %v4145_v0 }
 0x93d   :  { %3968 = vmatpush3.bf16.msra.mxu1 %v4304_v29 }
 0x93e   :  { %3969 = vmatprep.subr.bf16.mxu1 %v4145_v0 }
 0x941   :  { %3971 = vmatpush3.bf16.msra.mxu1 %v4310_v35 }
 0x942   :  { %3996 = vmatprep.subr.bf16.mxu1 %v4145_v0 }
 0x9d7   :  { %v1583_v21 = vpop.f32.mrb[16].mxu1 }
 0x9d8   :  { %v1653_v40 = vpop.f32.mrb[18].mxu0  ;;  %v3222_v41 = vpop.f32.mrb[17].mxu1 }
 0x9d9   :  { %v1654_v53 = vadd.f32 %v1653_v40, %v1583_v21  ;;  %v3257_v54 = vpop.f32.mrb[19].mxu0 }
 0x9db   :  { %v1657_v27 = vadd.f32 %v4355_v50, %v1654_v53 }
 0x9dd   :  { %4097 = vtanh.f32 %v1657_v27 }
 0x9e7   :  { %v4098_v47 = vpop.eup %4097 }
 0x9e8   :  { %1663 = vrot.lane.b32.xlu0 %v4098_v47, %s4150_s27  ;;  %v1659_v56 = vmul.f32 0.5, %v4098_v47 }
 0x9ea   :  { %v1660_v57 = vadd.f32 0.5, %v1659_v56 }
 0x9ec   :  { %1661 = vrot.lane.b32.xlu1 %v1660_v57, %s4149_s26 }
 0x9f0   :  { %1665 = vrot.lane.b32.xlu1 %v1660_v57, %s4148_s0 }
 0x9f7   :  { %v1738_v59 = vpop.f32.mrb[18].mxu1 }
 0x9f8   :  { %v1743_v60 = vrot.slane %v1738_v59, 4  ;;  %v3292_v62 = vpop.f32.mrb[19].mxu1 }
 0x9fa   :  { %v1745_v63 = vadd.f32 %v1743_v60, %v4288_v2 }
 0x9fc   :  { %4099 = vtanh.f32 %v1745_v63 }
 0xa06   :  { %v4100_v3 = vpop.eup %4099 }
 0xa07   :  { %v1755_v6 = vrot.slane %v4100_v3, 4  ;;  %v1747_v8 = vmul.f32 0.5, %v4100_v3 }
 0xa09   :  { %1757 = vrot.lane.b32.xlu0 %v1755_v6, %s4150_s27  ;;  %v1748_v50 = vadd.f32 0.5, %v1747_v8 }
 0xa0b   :  { %v1750_v9 = vrot.slane %v1748_v50, 4 }
 0xa0d   :  { %1759 = vrot.lane.b32.xlu0 %v1750_v9, %s4148_s0  ;;  %1752 = vrot.lane.b32.xlu1 %v1750_v9, %s4149_s26 }
 0xa5a   :  { %v1664_v10 = vpop.permute.xlu0 %1663 }
 0xa5b   :  { %v1668_v14 = vmul.f32 %v1664_v10, %v1660_v57 }
 0xa5e   :  { %v1662_v11 = vpop.permute.xlu1 %1661 }
 0xa5f   :  { %v1667_v15 = vmul.f32 %v1662_v11, %v4646_v33 }
 0xa61   :  { %v4715_v18 = vadd.f32 %v1668_v14, %v1667_v15 }
 0xa62   :  { %v1666_v4 = vpop.permute.xlu1 %1665 }
 0xa63   :  { %4101 = vtanh.f32 %v4715_v18 }
 0xa6d   :  { %v4102_v20 = vpop.eup %4101 }
 0xa6e   :  { %v1671_v24 = vmul.f32 %v4102_v20, %v1666_v4 }
 0xa70   :  { %3326 = vmatmul.mubr.f32.vlgmr.msra.gmra.mrb[20].mxu0 %v1671_v24  ;;  %v2210_v24 = vld [vmem:[#allocation2 + $0x198] ss:$0 sm:$0xff] }
 0xa71   :  { %3974 = vmatpush3.bf16.msra.mxu0 %v4181_v5  ;;  %3395 = vmatprep.mubr.msk.f32.mxu0 %vm4146_vm0, %v4147_v1 }
 0xa72   :  { %3975 = vmatprep.subr.bf16.mxu0 %v4145_v0 }
 0xa75   :  { %3977 = vmatpush3.bf16.msra.mxu0 %v4184_v7 }
 0xa76   :  { %3978 = vmatprep.subr.bf16.mxu0 %v4145_v0 }
 0xa79   :  { %3980 = vmatpush3.bf16.msra.mxu0 %v4194_v13 }
 0xa7a   :  { %3981 = vmatprep.subr.bf16.mxu0 %v4145_v0 }
 0xa7b   :  { %v1758_v26 = vpop.permute.xlu0 %1757 }
 0xa7c   :  { %v1763_v30 = vrot.slane %v1758_v26, 4 }
 0xa7d   :  { %3983 = vmatpush3.bf16.msra.mxu0 %v4201_v16 }
 0xa7e   :  { %v1765_v31 = vmul.f32 %v1763_v30, %v1748_v50  ;;  %3984 = vmatprep.subr.bf16.mxu0 %v4145_v0 }
 0xa7f   :  { %v1753_v5 = vpop.permute.xlu1 %1752  ;;  %v1760_v16 = vpop.permute.xlu0 %1759 }
 0xa80   :  { %v1767_v33 = vrot.slane %v1765_v31, 4  ;;  %v1761_v37 = vmul.f32 %v1753_v5, %v4648_v36  ;;  %v2211_v5 = vld [vmem:[#allocation2 + $0x1a0] ss:$0 sm:$0xff] }
 0xa81   :  { %3986 = vmatpush3.bf16.msra.mxu0 %v4205_v19 }
 0xa82   :  { %v4730_v7 = vadd.f32 %v1767_v33, %v1761_v37  ;;  %3987 = vmatprep.subr.bf16.mxu0 %v4145_v0 }
 0xa84   :  { %4103 = vtanh.f32 %v4730_v7 }
 0xa85   :  { %3989 = vmatpush3.bf16.msra.mxu0 %v4209_v22 }
 0xa86   :  { %3990 = vmatprep.subr.bf16.mxu0 %v4145_v0 }
 0xa89   :  { %3992 = vmatpush3.bf16.msra.mxu0 %v4213_v25 }
 0xa8a   :  { %3993 = vmatprep.subr.bf16.mxu0 %v4145_v0 }
 0xa8d   :  { %3995 = vmatpush3.bf16.msra.mxu0 %v4217_v28 }
 0xa8e   :  { %v4104_v13 = vpop.eup %4103  ;;  %4020 = vmatprep.subr.bf16.mxu0 %v4145_v0 }
 0xa8f   :  { %v1771_v19 = vmul.f32 %v4104_v13, %v1760_v16 }
 0xa91   :  { %3361 = vmatmul.mubr.f32.vlgmr.msra.gmra.mrb[20].mxu1 %v1771_v19  ;;  %3396 = vmatmul.mubr.f32.vlgmr.msra.gmra.mrb[22].mxu0 %v1771_v19 }
 0xa92   :  { %3998 = vmatpush3.bf16.msra.mxu1 %v4225_v32  ;;  %4022 = vmatpush3.bf16.msra.mxu0 %v4231_v39 }
 0xa93   :  { %3999 = vmatprep.subr.bf16.mxu1 %v4145_v0  ;;  %4023 = vmatprep.subr.bf16.mxu0 %v4145_v0 }
 0xa94   :  { %3430 = vmatprep.mubr.msk.f32.mxu1 %vm4146_vm0, %v4147_v1  ;;  %3465 = vmatprep.mubr.msk.f32.mxu0 %vm4146_vm0, %v4147_v1 }
 0xa96   :  { %4001 = vmatpush3.bf16.msra.mxu1 %v4228_v34  ;;  %4025 = vmatpush3.bf16.msra.mxu0 %v4238_v45  ;;  %v4117_v45 = vld [vmem:[#allocation2 + $0x190] ss:$0 sm:$0xff] }
 0xa97   :  { %4002 = vmatprep.subr.bf16.mxu1 %v4145_v0  ;;  %4026 = vmatprep.subr.bf16.mxu0 %v4145_v0 }
 0xa9a   :  { %4004 = vmatpush3.bf16.msra.mxu1 %v4234_v42  ;;  %4028 = vmatpush3.bf16.msra.mxu0 %v4246_v51 }
 0xa9b   :  { %4005 = vmatprep.subr.bf16.mxu1 %v4145_v0  ;;  %4029 = vmatprep.subr.bf16.mxu0 %v4145_v0 }
 0xa9e   :  { %4007 = vmatpush3.bf16.msra.mxu1 %v4242_v48  ;;  %4031 = vmatpush3.bf16.msra.mxu0 %v4293_v12 }
 0xa9f   :  { %4008 = vmatprep.subr.bf16.mxu1 %v4145_v0  ;;  %4032 = vmatprep.subr.bf16.mxu0 %v4145_v0 }
 0xaa2   :  { %4010 = vmatpush3.bf16.msra.mxu1 %v4250_v52  ;;  %4034 = vmatpush3.bf16.msra.mxu0 %v4297_v17 }
 0xaa3   :  { %4011 = vmatprep.subr.bf16.mxu1 %v4145_v0  ;;  %4035 = vmatprep.subr.bf16.mxu0 %v4145_v0 }
 0xaa6   :  { %4013 = vmatpush3.bf16.msra.mxu1 %v4256_v55  ;;  %4037 = vmatpush3.bf16.msra.mxu0 %v4301_v23 }
 0xaa7   :  { %4014 = vmatprep.subr.bf16.mxu1 %v4145_v0  ;;  %4038 = vmatprep.subr.bf16.mxu0 %v4145_v0 }
 0xaaa   :  { %4016 = vmatpush3.bf16.msra.mxu1 %v4260_v58  ;;  %4040 = vmatpush3.bf16.msra.mxu0 %v4304_v29 }
 0xaab   :  { %4017 = vmatprep.subr.bf16.mxu1 %v4145_v0  ;;  %4041 = vmatprep.subr.bf16.mxu0 %v4145_v0 }
 0xaae   :  { %4019 = vmatpush3.bf16.msra.mxu1 %v4264_v61  ;;  %4043 = vmatpush3.bf16.msra.mxu0 %v4310_v35 }
 0xb43   :  { %v1838_v1 = vpop.f32.mrb[20].mxu0 }
 0xb44   :  { %v3327_v22 = vpop.f32.mrb[21].mxu0 }
 0xb64   :  { %v1908_v25 = vpop.f32.mrb[20].mxu1  ;;  %v1993_v28 = vpop.f32.mrb[22].mxu0 }
 0xb65   :  { %v1909_v32 = vadd.f32 %v1908_v25, %v1838_v1  ;;  %v1998_v34 = vrot.slane %v1993_v28, 2  ;;  %v3362_v39 = vpop.f32.mrb[21].mxu1  ;;  %v3397_v42 = vpop.f32.mrb[23].mxu0 }
 0xb67   :  { %v1912_v48 = vadd.f32 %v4117_v45, %v1909_v32  ;;  %v2000_v51 = vadd.f32 %v1998_v34, %v4288_v2 }
 0xb69   :  { %4105 = vtanh.f32 %v1912_v48 }
 0xb6a   :  { %4107 = vtanh.f32 %v2000_v51 }
 0xb73   :  { %v4106_v52 = vpop.eup %4105 }
 0xb74   :  { %v4108_v0 = vpop.eup %4107  ;;  %v1914_v55 = vmul.f32 0.5, %v4106_v52 }
 0xb75   :  { %v2010_v58 = vrot.slane %v4108_v0, 6  ;;  %v2002_v61 = vmul.f32 0.5, %v4108_v0 }
 0xb76   :  { %v1915_v12 = vadd.f32 0.5, %v1914_v55 }
 0xb77   :  { %2012 = vrot.lane.b32.xlu1 %v2010_v58, %s4150_s27  ;;  %v2003_v17 = vadd.f32 0.5, %v2002_v61 }
 0xb78   :  { %1916 = vrot.lane.b32.xlu0 %v1915_v12, %s4149_s26 }
 0xb79   :  { %v2005_v23 = vrot.slane %v2003_v17, 6 }
 0xb7b   :  { %1918 = vrot.lane.b32.xlu1 %v4106_v52, %s4150_s27 }
 0xb7c   :  { %2007 = vrot.lane.b32.xlu0 %v2005_v23, %s4149_s26 }
 0xb7f   :  { %1920 = vrot.lane.b32.xlu1 %v1915_v12, %s4148_s0 }
 0xb80   :  { %2014 = vrot.lane.b32.xlu0 %v2005_v23, %s4148_s0 }
 0xbe9   :  { %v2013_v2 = vpop.permute.xlu1 %2012 }
 0xbea   :  { %v2018_v29 = vrot.slane %v2013_v2, 2  ;;  %v1917_v35 = vpop.permute.xlu0 %1916 }
 0xbeb   :  { %v1922_v44 = vmul.f32 %v1917_v35, %v4715_v18 }
 0xbec   :  { %v2020_v36 = vmul.f32 %v2018_v29, %v2003_v17 }
 0xbed   :  { %v1919_v43 = vpop.permute.xlu1 %1918 }
 0xbee   :  { %v1923_v46 = vmul.f32 %v1919_v43, %v1915_v12  ;;  %v2008_v49 = vpop.permute.xlu0 %2007  ;;  %v2022_v38 = vrot.slane %v2020_v36, 6 }
 0xbef   :  { %v2016_v21 = vmul.f32 %v2008_v49, %v4730_v7 }
 0xbf0   :  { %v1924_v40 = vadd.f32 %v1923_v46, %v1922_v44 }
 0xbf1   :  { %v2024_v41 = vadd.f32 %v2022_v38, %v2016_v21  ;;  %v1921_v54 = vpop.permute.xlu1 %1920 }
 0xbf2   :  { %4109 = vtanh.f32 %v1924_v40  ;;  %v2015_v56 = vpop.permute.xlu0 %2014 }
 0xbf3   :  { %4111 = vtanh.f32 %v2024_v41 }
 0xbfc   :  { %v4110_v53 = vpop.eup %4109 }
 0xbfd   :  { %v4112_v27 = vpop.eup %4111  ;;  %v1926_v47 = vmul.f32 %v4110_v53, %v1921_v54 }
 0xbfe   :  { %v2026_v57 = vmul.f32 %v4112_v27, %v2015_v56 }
 0xbff   :  { %3431 = vmatmul.mubr.f32.vlgmr.msra.gmra.mrb[22].mxu1 %v1926_v47 }
 0xc00   :  { %3466 = vmatmul.mubr.f32.vlgmr.msra.gmra.mrb[24].mxu0 %v2026_v57 }
 0xcd2   :  { %v2093_v59 = vpop.f32.mrb[22].mxu1 }
 0xcd3   :  { %v3432_v60 = vpop.f32.mrb[23].mxu1  ;;  %v2163_v62 = vpop.f32.mrb[24].mxu0 }
 0xcd4   :  { %v2164_v63 = vadd.f32 %v2163_v62, %v2093_v59  ;;  %v3467_v3 = vpop.f32.mrb[25].mxu0 }
 0xcd6   :  { %v2167_v6 = vadd.f32 %v4117_v45, %v2164_v63 }
 0xcd8   :  { %4113 = vtanh.f32 %v2167_v6 }
 0xce2   :  { %v4114_v8 = vpop.eup %4113 }
 0xce3   :  { %2173 = vrot.lane.b32.xlu0 %v4114_v8, %s4150_s27  ;;  %v2169_v50 = vmul.f32 0.5, %v4114_v8 }
 0xce5   :  { %v2170_v9 = vadd.f32 0.5, %v2169_v50 }
 0xce7   :  { %2171 = vrot.lane.b32.xlu1 %v2170_v9, %s4149_s26 }
 0xceb   :  { %2175 = vrot.lane.b32.xlu1 %v2170_v9, %s4148_s0 }
 0xd55   :  { %v2174_v10 = vpop.permute.xlu0 %2173 }
 0xd56   :  { %v2178_v14 = vmul.f32 %v2174_v10, %v2170_v9 }
 0xd59   :  { %v2172_v11 = vpop.permute.xlu1 %2171 }
 0xd5a   :  { %v2177_v15 = vmul.f32 %v2172_v11, %v1924_v40 }
 0xd5c   :  { %v2179_v18 = vadd.f32 %v2178_v14, %v2177_v15 }
 0xd5d   :  { %v2176_v4 = vpop.permute.xlu1 %2175 }
 0xd5e   :  { %4115 = vtanh.f32 %v2179_v18 }
 0xd68   :  { %v4116_v20 = vpop.eup %4115 }
 0xd69   :  { %v2181_v26 = vmul.f32 %v4116_v20, %v2176_v4 }
 0xd6b   :  { %v2188_v30 = vmul.f32 %v2210_v24, %v2181_v26 }
 0xd6d   :  { %v2190_v31 = vsel %vm2189_vm3, %v2188_v30, 0.0 }
 0xd6e   :  { %2191 = vadd.xlane.f32.xlu0 %v2190_v31 }
 0xdfb   :  { %v2192_v33 = vpop.xlane.xlu0 %2191 }
 0xdfc   :  { %v2197_v37 = vadd.f32 %v2211_v5, %v2192_v33 }
 0xdfe   :  { %2199 = vst.msk [vmem:[%s4791_s2] sm:$0x3] %vm2198_vm4, %v2197_v37 }
 0xdff   :  { %2204 = vsyncpa [#allocation3], 1 }

</bundles_post_ra>
